<compile_context>
chip_gen: v5e
topology: v5e:2x2
jax: 0.10.0
libtpu: 0.0.40
codegen_flags: <defaults>
</compile_context>

<pallas_src>
import functools

import jax
import jax.numpy as jnp
from jax import lax
from jax.experimental import pallas as pl
from jax.experimental.pallas import tpu as pltpu


# ----------------------------------------------------------------------------
# Kernel 1: fused input projection
#   y = x @ [Wq | Wk | Wv | W_ih_q] + [bq | bk | bv | (b_ih + b_hh)]
#   x: (B*L, D), W: (D, 3D + 4D), out: (B*L, 7D)  (lane-dense output slab)
# ----------------------------------------------------------------------------
def _fused_proj_kernel(x_ref, w_ref, b_ref, o_ref):
    o_ref[...] = (
        jnp.dot(x_ref[...], w_ref[...], preferred_element_type=jnp.float32)
        + b_ref[...]
    )


def fused_proj(x, w, b):
    M, K = x.shape
    N = w.shape[1]
    return pl.pallas_call(
        _fused_proj_kernel,
        out_shape=jax.ShapeDtypeStruct((M, N), jnp.float32),
        grid=(1,),
        in_specs=[
            pl.BlockSpec((M, K), lambda i: (0, 0)),
            pl.BlockSpec((K, N), lambda i: (0, 0)),
            pl.BlockSpec((1, N), lambda i: (0, 0)),
        ],
        out_specs=pl.BlockSpec((M, N), lambda i: (0, 0)),
    )(x, w, b)


# ----------------------------------------------------------------------------
# Kernel 2: attention core, one grid step per batch, all heads in the block.
#   softmax(Q K^T * (2/dh)) V   (the 2/dh factor reproduces the PyTorch
#   precedence bug: score / (dh ** 1 / 2) == score / (dh / 2))
# ----------------------------------------------------------------------------
def _attn_core_kernel(q_ref, k_ref, v_ref, o_ref, p_ref, *, inv_scale):
    q = q_ref[...]                                     # (H, L, dh)
    k = k_ref[...]
    v = v_ref[...]
    # Batched contraction over the last dims — no explicit transpose of K.
    s = jnp.einsum("hqd,hkd->hqk", q, k,
                   preferred_element_type=jnp.float32) * inv_scale   # (H, L, L)
    s = s - jnp.max(s, axis=-1, keepdims=True)          # numerically stable softmax
    e = jnp.exp(s)
    p = e * pl.reciprocal(jnp.sum(e, axis=-1, keepdims=True), approx=True)
    p_ref[...] = p                                      # attention distribution
    o_ref[...] = jnp.einsum("hqk,hkd->hqd", p, v,
                            preferred_element_type=jnp.float32)


def attn_core(q, k, v, dim_head):
    B, H, L, dh = q.shape
    inv_scale = 2.0 / float(dim_head)
    kernel = functools.partial(_attn_core_kernel, inv_scale=inv_scale)
    return pl.pallas_call(
        kernel,
        out_shape=(
            jax.ShapeDtypeStruct((B, H, L, dh), jnp.float32),
            jax.ShapeDtypeStruct((B, H, L, L), jnp.float32),
        ),
        grid=(B,),
        in_specs=[
            pl.BlockSpec((None, H, L, dh), lambda b: (b, 0, 0, 0)),
            pl.BlockSpec((None, H, L, dh), lambda b: (b, 0, 0, 0)),
            pl.BlockSpec((None, H, L, dh), lambda b: (b, 0, 0, 0)),
        ],
        out_specs=(
            pl.BlockSpec((None, H, L, dh), lambda b: (b, 0, 0, 0)),
            pl.BlockSpec((None, H, L, L), lambda b: (b, 0, 0, 0)),
        ),
        compiler_params=pltpu.CompilerParams(dimension_semantics=("parallel",)),
    )(q, k, v)


# ----------------------------------------------------------------------------
# Kernel 3: attention out-projection fused with the attn-half of the LSTM
# x-path pre-activation:
#   a  = attn_re @ Wout + bout                     (the module-internal `attn`)
#   xw = xw_q + a @ W_ih_attn                      (full x-path gate pre-act.)
# `a` never leaves VMEM.
# ----------------------------------------------------------------------------
def _out_proj_xw_kernel(attn_ref, wout_ref, bout_ref, wia_ref, xwq_ref, xw_ref):
    a = (jnp.dot(attn_ref[...], wout_ref[...], preferred_element_type=jnp.float32)
         + bout_ref[...])
    xw_ref[...] = xwq_ref[...] + jnp.dot(
        a, wia_ref[...], preferred_element_type=jnp.float32)


def out_proj_xw(attn_re, wout, bout, w_ih_attn, xw_q):
    M, D = attn_re.shape
    N = w_ih_attn.shape[1]
    return pl.pallas_call(
        _out_proj_xw_kernel,
        out_shape=jax.ShapeDtypeStruct((M, N), jnp.float32),
        grid=(1,),
        in_specs=[
            pl.BlockSpec((M, D), lambda i: (0, 0)),
            pl.BlockSpec((D, D), lambda i: (0, 0)),
            pl.BlockSpec((1, D), lambda i: (0, 0)),
            pl.BlockSpec((D, N), lambda i: (0, 0)),
            pl.BlockSpec((M, N), lambda i: (0, 0)),
        ],
        out_specs=pl.BlockSpec((M, N), lambda i: (0, 0)),
    )(attn_re, wout, bout, w_ih_attn, xw_q)


# ----------------------------------------------------------------------------
# Kernel 4: LSTM recurrence (x-path already hoisted & bias-folded).
#   xw_tm: (L, B, 4H) time-major pre-activations; U_all: (H, 4H)
#   per step: z = xw[t] + h @ U_all; gates (i, f, g, o) sliced from z.
# h/c are carried in vregs; recurrence fully unrolled (L small & static).
# ----------------------------------------------------------------------------
def _lstm_kernel(xw_ref, u_ref, all_ref, last_ref, *, hidden):
    Lt, Bt, _ = xw_ref.shape
    Hd = hidden
    u = u_ref[...]                                      # hoisted once
    h = jnp.zeros((Bt, Hd), jnp.float32)
    c = jnp.zeros((Bt, Hd), jnp.float32)
    for t in range(Lt):                                 # fully unrolled
        z = xw_ref[t] + jnp.dot(h, u, preferred_element_type=jnp.float32)
        i_g = jax.nn.sigmoid(z[:, 0 * Hd:1 * Hd])
        f_g = jax.nn.sigmoid(z[:, 1 * Hd:2 * Hd])
        g_g = jnp.tanh(z[:, 2 * Hd:3 * Hd])
        o_g = jax.nn.sigmoid(z[:, 3 * Hd:4 * Hd])
        c = f_g * c + i_g * g_g
        h = o_g * jnp.tanh(c)
        all_ref[t] = h
    last_ref[...] = h


def lstm_recurrence(xw_tm, u_all, hidden):
    L, B, G = xw_tm.shape
    kernel = functools.partial(_lstm_kernel, hidden=hidden)
    return pl.pallas_call(
        kernel,
        out_shape=(
            jax.ShapeDtypeStruct((L, B, hidden), jnp.float32),
            jax.ShapeDtypeStruct((B, hidden), jnp.float32),
        ),
        grid=(1,),
        in_specs=[
            pl.BlockSpec((L, B, G), lambda i: (0, 0, 0)),
            pl.BlockSpec((hidden, G), lambda i: (0, 0)),
        ],
        out_specs=(
            pl.BlockSpec((L, B, hidden), lambda i: (0, 0, 0)),
            pl.BlockSpec((B, hidden), lambda i: (0, 0)),
        ),
    )(xw_tm, u_all)


# ----------------------------------------------------------------------------
# Parameter init (deterministic, PyTorch-style uniform fan-in bounds),
# packed directly into the fused layouts.
# ----------------------------------------------------------------------------
def init_params(key, dim_model):
    D = dim_model
    H4 = 4 * D
    keys = jax.random.split(key, 12)

    def unif(k, shape, fan_in):
        bound = 1.0 / float(fan_in) ** 0.5
        return jax.random.uniform(k, shape, jnp.float32, -bound, bound)

    Wq, bq = unif(keys[0], (D, D), D), unif(keys[1], (1, D), D)
    Wk, bk = unif(keys[2], (D, D), D), unif(keys[3], (1, D), D)
    Wv, bv = unif(keys[4], (D, D), D), unif(keys[5], (1, D), D)
    Wout, bout = unif(keys[6], (D, D), D), unif(keys[7], (1, D), D)

    # LSTM (PyTorch layout, pre-transposed). Gate order (i, f, g, o),
    # bound 1/sqrt(hidden).  b_all = b_ih + b_hh.
    W_ih = unif(keys[8], (2 * D, H4), D)     # x-path weights (2D, 4H)
    U_all = unif(keys[9], (D, H4), D)        # h-path weights (H, 4H)
    b_all = unif(keys[10], (1, H4), D) + unif(keys[11], (1, H4), D)

    return {
        # fused input projection: [Wq | Wk | Wv | W_ih(Q-part)], bias incl. b_all
        "W_in": jnp.concatenate([Wq, Wk, Wv, W_ih[:D]], axis=1),   # (D, 3D+4D)
        "b_in": jnp.concatenate([bq, bk, bv, b_all], axis=1),      # (1, 3D+4D)
        "Wout": Wout,
        "bout": bout,
        "W_ih_attn": W_ih[D:],                                     # (D, 4D)
        "U_all": U_all,                                            # (D, 4D)
    }


# ----------------------------------------------------------------------------
# EncoderBlock forward
# ----------------------------------------------------------------------------
def encoder_block_forward(params, Q, num_head):
    B, L, D = Q.shape
    dh = D // num_head

    x2 = Q.reshape(B * L, D)
    proj = fused_proj(x2, params["W_in"], params["b_in"])          # (B*L, 7D)

    # PyTorch does a plain reshape (B, L, D) -> (B, H, L, dh) (not a transpose
    # split); reshaping the flat (B*L, D) slice directly is identical.
    q = proj[:, 0 * D:1 * D].reshape(B, num_head, L, dh)
    k = proj[:, 1 * D:2 * D].reshape(B, num_head, L, dh)
    v = proj[:, 2 * D:3 * D].reshape(B, num_head, L, dh)
    xw_q = proj[:, 3 * D:]                                         # (B*L, 4D)

    attn_h, attn_dist = attn_core(q, k, v, dh)

    # Faithful plain reshape (B, H, L, dh) -> (B, L, H*dh), flattened.
    attn_re = attn_h.reshape(B * L, D)

    # out-projection + attn-half of the LSTM x-path, fused in one kernel.
    xw = out_proj_xw(attn_re, params["Wout"], params["bout"],
                     params["W_ih_attn"], xw_q)                    # (B*L, 4D)
    xw_tm = xw.reshape(B, L, 4 * D).transpose(1, 0, 2)             # (L, B, 4D)

    all_tm, last_h = lstm_recurrence(xw_tm, params["U_all"], D)    # (L,B,D),(B,D)
    all_state = all_tm.transpose(1, 0, 2)                          # (B, L, D)
    last_state = last_h[None]                                      # (1, B, D)
    return all_state, last_state, attn_dist


# ----------------------------------------------------------------------------
if __name__ == "__main__":
    dim_model, num_head = 32, 4
    B, L = 2, 8

    key = jax.random.PRNGKey(0)
    kparams, kq = jax.random.split(key)
    params = init_params(kparams, dim_model)
    Q = jax.random.normal(kq, (B, L, dim_model), jnp.float32)

    fwd = jax.jit(functools.partial(encoder_block_forward, num_head=num_head))
    all_state, last_state, self_attn = fwd(params, Q)
    jax.block_until_ready((all_state, last_state, self_attn))

    assert all_state.shape == (B, L, dim_model)
    assert last_state.shape == (1, B, dim_model)
    assert self_attn.shape == (B, num_head, L, L)
    assert bool(jnp.all(jnp.isfinite(all_state)))
    assert bool(jnp.all(jnp.isfinite(self_attn)))
    print("KERNEL_OK")
</pallas_src>

<mosaic_0001>
module attributes {stable_mosaic.version = 11 : i64} {
  func.func @_fused_proj_kernel(%arg0: i32, %arg1: memref<16x32xf32, #tpu.memory_space<vmem>>, %arg2: memref<32x224xf32, #tpu.memory_space<vmem>>, %arg3: memref<1x224xf32, #tpu.memory_space<vmem>>, %arg4: memref<16x224xf32, #tpu.memory_space<vmem>>) attributes {dimension_semantics = [#tpu.dimension_semantics<arbitrary>], iteration_bounds = array<i64: 1>, scalar_prefetch = 0 : i64, scratch_operands = 0 : i64, tpu.core_type = #tpu.core_type<tc>, window_params = [{pipeline_mode = #tpu.pipeline_mode<synchronous>, transform_indices = @transform_0, window_bounds = array<i64: 16, 32>}, {pipeline_mode = #tpu.pipeline_mode<synchronous>, transform_indices = @transform_1, window_bounds = array<i64: 32, 224>}, {pipeline_mode = #tpu.pipeline_mode<synchronous>, transform_indices = @transform_2, window_bounds = array<i64: 1, 224>}, {pipeline_mode = #tpu.pipeline_mode<synchronous>, transform_indices = @transform_3, window_bounds = array<i64: 16, 224>}]} {
    %c0 = arith.constant 0 : index
    %c0_0 = arith.constant 0 : index
    %0 = vector.load %arg1[%c0, %c0_0] : memref<16x32xf32, #tpu.memory_space<vmem>>, vector<16x32xf32>
    %c0_1 = arith.constant 0 : index
    %c0_2 = arith.constant 0 : index
    %1 = vector.load %arg2[%c0_1, %c0_2] : memref<32x224xf32, #tpu.memory_space<vmem>>, vector<32x224xf32>
    %cst = arith.constant dense<0.000000e+00> : vector<16x224xf32>
    %2 = tpu.matmul %0, %1, %cst {dimension_numbers = #tpu.dot_dimension_numbers<[1], [0], [0], [1], [0, 0, 1, 1], [], []>} : vector<16x32xf32>, vector<32x224xf32>, vector<16x224xf32> -> vector<16x224xf32>
    %c0_3 = arith.constant 0 : index
    %c0_4 = arith.constant 0 : index
    %3 = vector.load %arg3[%c0_3, %c0_4] : memref<1x224xf32, #tpu.memory_space<vmem>>, vector<1x224xf32>
    %4 = vector.broadcast %3 : vector<1x224xf32> to vector<16x224xf32>
    %5 = arith.addf %2, %4 : vector<16x224xf32>
    %c0_5 = arith.constant 0 : index
    %c0_6 = arith.constant 0 : index
    %6 = vector.load %arg4[%c0_5, %c0_6] : memref<16x224xf32, #tpu.memory_space<vmem>>, vector<16x224xf32>
    tpu.vector_store %arg4[%c0_5, %c0_6], %5 {strides = array<i32>} : memref<16x224xf32, #tpu.memory_space<vmem>>, vector<16x224xf32>,
    return
  }
  func.func @transform_0(%arg0: i32) -> (i32, i32) {
    %c0_i32 = arith.constant 0 : i32
    %c0_i32_0 = arith.constant 0 : i32
    %c0_i32_1 = arith.constant 0 : i32
    return %c0_i32, %c0_i32_0 : i32, i32
  }
  func.func @transform_1(%arg0: i32) -> (i32, i32) {
    %c0_i32 = arith.constant 0 : i32
    %c0_i32_0 = arith.constant 0 : i32
    %c0_i32_1 = arith.constant 0 : i32
    return %c0_i32, %c0_i32_0 : i32, i32
  }
  func.func @transform_2(%arg0: i32) -> (i32, i32) {
    %c0_i32 = arith.constant 0 : i32
    %c0_i32_0 = arith.constant 0 : i32
    %c0_i32_1 = arith.constant 0 : i32
    return %c0_i32, %c0_i32_0 : i32, i32
  }
  func.func @transform_3(%arg0: i32) -> (i32, i32) {
    %c0_i32 = arith.constant 0 : i32
    %c0_i32_0 = arith.constant 0 : i32
    %c0_i32_1 = arith.constant 0 : i32
    return %c0_i32, %c0_i32_0 : i32, i32
  }
}

module attributes {stable_mosaic.version = 11 : i64} {
  func.func @_attn_core_kernel(%arg0: i32, %arg1: memref<1x4x8x8xf32, #tpu.memory_space<vmem>>, %arg2: memref<1x4x8x8xf32, #tpu.memory_space<vmem>>, %arg3: memref<1x4x8x8xf32, #tpu.memory_space<vmem>>, %arg4: memref<1x4x8x8xf32, #tpu.memory_space<vmem>>, %arg5: memref<1x4x8x8xf32, #tpu.memory_space<vmem>>) attributes {dimension_semantics = [#tpu.dimension_semantics<parallel>], iteration_bounds = array<i64: 2>, scalar_prefetch = 0 : i64, scratch_operands = 0 : i64, tpu.core_type = #tpu.core_type<tc>, window_params = [{transform_indices = @transform_0, window_bounds = array<i64: 1, 4, 8, 8>}, {transform_indices = @transform_1, window_bounds = array<i64: 1, 4, 8, 8>}, {transform_indices = @transform_2, window_bounds = array<i64: 1, 4, 8, 8>}, {transform_indices = @transform_3, window_bounds = array<i64: 1, 4, 8, 8>}, {transform_indices = @transform_4, window_bounds = array<i64: 1, 4, 8, 8>}]} {
    %c0 = arith.constant 0 : index
    %c0_0 = arith.constant 0 : index
    %c0_1 = arith.constant 0 : index
    %c0_2 = arith.constant 0 : index
    %0 = vector.load %arg1[%c0, %c0_0, %c0_1, %c0_2] : memref<1x4x8x8xf32, #tpu.memory_space<vmem>>, vector<1x4x8x8xf32>
    %1 = vector.shape_cast %0 : vector<1x4x8x8xf32> to vector<4x8x8xf32>
    %c0_3 = arith.constant 0 : index
    %c0_4 = arith.constant 0 : index
    %c0_5 = arith.constant 0 : index
    %c0_6 = arith.constant 0 : index
    %2 = vector.load %arg2[%c0_3, %c0_4, %c0_5, %c0_6] : memref<1x4x8x8xf32, #tpu.memory_space<vmem>>, vector<1x4x8x8xf32>
    %3 = vector.shape_cast %2 : vector<1x4x8x8xf32> to vector<4x8x8xf32>
    %c0_7 = arith.constant 0 : index
    %c0_8 = arith.constant 0 : index
    %c0_9 = arith.constant 0 : index
    %c0_10 = arith.constant 0 : index
    %4 = vector.load %arg3[%c0_7, %c0_8, %c0_9, %c0_10] : memref<1x4x8x8xf32, #tpu.memory_space<vmem>>, vector<1x4x8x8xf32>
    %5 = vector.shape_cast %4 : vector<1x4x8x8xf32> to vector<4x8x8xf32>
    "tpu.trace_start"() <{level = 10 : i32, message = "hqd,hkd->hqk"}> : () -> ()
    %cst = arith.constant dense<0.000000e+00> : vector<4x8x8xf32>
    %6 = tpu.matmul %1, %3, %cst {dimension_numbers = #tpu.dot_dimension_numbers<[2], [2], [1], [1], [0, 0, 0, 1, 1, 1], [0], [0]>} : vector<4x8x8xf32>, vector<4x8x8xf32>, vector<4x8x8xf32> -> vector<4x8x8xf32>
    "tpu.trace_stop"() : () -> ()
    %cst_11 = arith.constant 2.500000e-01 : f32
    %7 = vector.broadcast %cst_11 : f32 to vector<4x8x8xf32>
    %8 = arith.mulf %6, %7 : vector<4x8x8xf32>
    %cst_12 = arith.constant dense<0xFF800000> : vector<4x8xf32>
    %9 = vector.multi_reduction <maximumf>, %8, %cst_12 [2] : vector<4x8x8xf32> to vector<4x8xf32>
    %10 = vector.shape_cast %9 : vector<4x8xf32> to vector<4x8x1xf32>
    %11 = vector.broadcast %10 : vector<4x8x1xf32> to vector<4x8x8xf32>
    %12 = arith.subf %8, %11 : vector<4x8x8xf32>
    %13 = math.exp %12 : vector<4x8x8xf32>
    %cst_13 = arith.constant dense<0.000000e+00> : vector<4x8xf32>
    %14 = vector.multi_reduction <add>, %13, %cst_13 [2] : vector<4x8x8xf32> to vector<4x8xf32>
    %15 = vector.shape_cast %14 : vector<4x8xf32> to vector<4x8x1xf32>
    %16 = tpu.reciprocal %15 {approx = true} : vector<4x8x1xf32> -> vector<4x8x1xf32>
    %17 = vector.broadcast %16 : vector<4x8x1xf32> to vector<4x8x8xf32>
    %18 = arith.mulf %13, %17 : vector<4x8x8xf32>
    %c0_14 = arith.constant 0 : index
    %c0_15 = arith.constant 0 : index
    %c0_16 = arith.constant 0 : index
    %c0_17 = arith.constant 0 : index
    %19 = vector.load %arg5[%c0_14, %c0_15, %c0_16, %c0_17] : memref<1x4x8x8xf32, #tpu.memory_space<vmem>>, vector<1x4x8x8xf32>
    %20 = vector.shape_cast %19 : vector<1x4x8x8xf32> to vector<4x8x8xf32>
    %21 = vector.shape_cast %18 : vector<4x8x8xf32> to vector<1x4x8x8xf32>
    tpu.vector_store %arg5[%c0_14, %c0_15, %c0_16, %c0_17], %21 {strides = array<i32>} : memref<1x4x8x8xf32, #tpu.memory_space<vmem>>, vector<1x4x8x8xf32>,
    "tpu.trace_start"() <{level = 10 : i32, message = "hqk,hkd->hqd"}> : () -> ()
    %cst_18 = arith.constant dense<0.000000e+00> : vector<4x8x8xf32>
    %22 = tpu.matmul %18, %5, %cst_18 {dimension_numbers = #tpu.dot_dimension_numbers<[2], [1], [1], [2], [0, 0, 0, 1, 1, 2], [0], [0]>} : vector<4x8x8xf32>, vector<4x8x8xf32>, vector<4x8x8xf32> -> vector<4x8x8xf32>
    "tpu.trace_stop"() : () -> ()
    %c0_19 = arith.constant 0 : index
    %c0_20 = arith.constant 0 : index
    %c0_21 = arith.constant 0 : index
    %c0_22 = arith.constant 0 : index
    %23 = vector.load %arg4[%c0_19, %c0_20, %c0_21, %c0_22] : memref<1x4x8x8xf32, #tpu.memory_space<vmem>>, vector<1x4x8x8xf32>
    %24 = vector.shape_cast %23 : vector<1x4x8x8xf32> to vector<4x8x8xf32>
    %25 = vector.shape_cast %22 : vector<4x8x8xf32> to vector<1x4x8x8xf32>
    tpu.vector_store %arg4[%c0_19, %c0_20, %c0_21, %c0_22], %25 {strides = array<i32>} : memref<1x4x8x8xf32, #tpu.memory_space<vmem>>, vector<1x4x8x8xf32>,
    return
  }
  func.func @transform_0(%arg0: i32) -> (i32, i32, i32, i32) {
    %c0_i32 = arith.constant 0 : i32
    %c0_i32_0 = arith.constant 0 : i32
    %c0_i32_1 = arith.constant 0 : i32
    %c0_i32_2 = arith.constant 0 : i32
    return %arg0, %c0_i32, %c0_i32_0, %c0_i32_1 : i32, i32, i32, i32
  }
  func.func @transform_1(%arg0: i32) -> (i32, i32, i32, i32) {
    %c0_i32 = arith.constant 0 : i32
    %c0_i32_0 = arith.constant 0 : i32
    %c0_i32_1 = arith.constant 0 : i32
    %c0_i32_2 = arith.constant 0 : i32
    return %arg0, %c0_i32, %c0_i32_0, %c0_i32_1 : i32, i32, i32, i32
  }
  func.func @transform_2(%arg0: i32) -> (i32, i32, i32, i32) {
    %c0_i32 = arith.constant 0 : i32
    %c0_i32_0 = arith.constant 0 : i32
    %c0_i32_1 = arith.constant 0 : i32
    %c0_i32_2 = arith.constant 0 : i32
    return %arg0, %c0_i32, %c0_i32_0, %c0_i32_1 : i32, i32, i32, i32
  }
  func.func @transform_3(%arg0: i32) -> (i32, i32, i32, i32) {
    %c0_i32 = arith.constant 0 : i32
    %c0_i32_0 = arith.constant 0 : i32
    %c0_i32_1 = arith.constant 0 : i32
    %c0_i32_2 = arith.constant 0 : i32
    return %arg0, %c0_i32, %c0_i32_0, %c0_i32_1 : i32, i32, i32, i32
  }
  func.func @transform_4(%arg0: i32) -> (i32, i32, i32, i32) {
    %c0_i32 = arith.constant 0 : i32
    %c0_i32_0 = arith.constant 0 : i32
    %c0_i32_1 = arith.constant 0 : i32
    %c0_i32_2 = arith.constant 0 : i32
    return %arg0, %c0_i32, %c0_i32_0, %c0_i32_1 : i32, i32, i32, i32
  }
}

module attributes {stable_mosaic.version = 11 : i64} {
  func.func @_out_proj_xw_kernel(%arg0: i32, %arg1: memref<16x32xf32, #tpu.memory_space<vmem>>, %arg2: memref<32x32xf32, #tpu.memory_space<vmem>>, %arg3: memref<1x32xf32, #tpu.memory_space<vmem>>, %arg4: memref<32x128xf32, #tpu.memory_space<vmem>>, %arg5: memref<16x128xf32, #tpu.memory_space<vmem>>, %arg6: memref<16x128xf32, #tpu.memory_space<vmem>>) attributes {dimension_semantics = [#tpu.dimension_semantics<arbitrary>], iteration_bounds = array<i64: 1>, scalar_prefetch = 0 : i64, scratch_operands = 0 : i64, tpu.core_type = #tpu.core_type<tc>, window_params = [{pipeline_mode = #tpu.pipeline_mode<synchronous>, transform_indices = @transform_0, window_bounds = array<i64: 16, 32>}, {pipeline_mode = #tpu.pipeline_mode<synchronous>, transform_indices = @transform_1, window_bounds = array<i64: 32, 32>}, {pipeline_mode = #tpu.pipeline_mode<synchronous>, transform_indices = @transform_2, window_bounds = array<i64: 1, 32>}, {pipeline_mode = #tpu.pipeline_mode<synchronous>, transform_indices = @transform_3, window_bounds = array<i64: 32, 128>}, {pipeline_mode = #tpu.pipeline_mode<synchronous>, transform_indices = @transform_4, window_bounds = array<i64: 16, 128>}, {pipeline_mode = #tpu.pipeline_mode<synchronous>, transform_indices = @transform_5, window_bounds = array<i64: 16, 128>}]} {
    %c0 = arith.constant 0 : index
    %c0_0 = arith.constant 0 : index
    %0 = vector.load %arg1[%c0, %c0_0] : memref<16x32xf32, #tpu.memory_space<vmem>>, vector<16x32xf32>
    %c0_1 = arith.constant 0 : index
    %c0_2 = arith.constant 0 : index
    %1 = vector.load %arg2[%c0_1, %c0_2] : memref<32x32xf32, #tpu.memory_space<vmem>>, vector<32x32xf32>
    %cst = arith.constant dense<0.000000e+00> : vector<16x32xf32>
    %2 = tpu.matmul %0, %1, %cst {dimension_numbers = #tpu.dot_dimension_numbers<[1], [0], [0], [1], [0, 0, 1, 1], [], []>} : vector<16x32xf32>, vector<32x32xf32>, vector<16x32xf32> -> vector<16x32xf32>
    %c0_3 = arith.constant 0 : index
    %c0_4 = arith.constant 0 : index
    %3 = vector.load %arg3[%c0_3, %c0_4] : memref<1x32xf32, #tpu.memory_space<vmem>>, vector<1x32xf32>
    %4 = vector.broadcast %3 : vector<1x32xf32> to vector<16x32xf32>
    %5 = arith.addf %2, %4 : vector<16x32xf32>
    %c0_5 = arith.constant 0 : index
    %c0_6 = arith.constant 0 : index
    %6 = vector.load %arg5[%c0_5, %c0_6] : memref<16x128xf32, #tpu.memory_space<vmem>>, vector<16x128xf32>
    %c0_7 = arith.constant 0 : index
    %c0_8 = arith.constant 0 : index
    %7 = vector.load %arg4[%c0_7, %c0_8] : memref<32x128xf32, #tpu.memory_space<vmem>>, vector<32x128xf32>
    %cst_9 = arith.constant dense<0.000000e+00> : vector<16x128xf32>
    %8 = tpu.matmul %5, %7, %cst_9 {dimension_numbers = #tpu.dot_dimension_numbers<[1], [0], [0], [1], [0, 0, 1, 1], [], []>} : vector<16x32xf32>, vector<32x128xf32>, vector<16x128xf32> -> vector<16x128xf32>
    %9 = arith.addf %6, %8 : vector<16x128xf32>
    %c0_10 = arith.constant 0 : index
    %c0_11 = arith.constant 0 : index
    %10 = vector.load %arg6[%c0_10, %c0_11] : memref<16x128xf32, #tpu.memory_space<vmem>>, vector<16x128xf32>
    tpu.vector_store %arg6[%c0_10, %c0_11], %9 {strides = array<i32>} : memref<16x128xf32, #tpu.memory_space<vmem>>, vector<16x128xf32>,
    return
  }
  func.func @transform_0(%arg0: i32) -> (i32, i32) {
    %c0_i32 = arith.constant 0 : i32
    %c0_i32_0 = arith.constant 0 : i32
    %c0_i32_1 = arith.constant 0 : i32
    return %c0_i32, %c0_i32_0 : i32, i32
  }
  func.func @transform_1(%arg0: i32) -> (i32, i32) {
    %c0_i32 = arith.constant 0 : i32
    %c0_i32_0 = arith.constant 0 : i32
    %c0_i32_1 = arith.constant 0 : i32
    return %c0_i32, %c0_i32_0 : i32, i32
  }
  func.func @transform_2(%arg0: i32) -> (i32, i32) {
    %c0_i32 = arith.constant 0 : i32
    %c0_i32_0 = arith.constant 0 : i32
    %c0_i32_1 = arith.constant 0 : i32
    return %c0_i32, %c0_i32_0 : i32, i32
  }
  func.func @transform_3(%arg0: i32) -> (i32, i32) {
    %c0_i32 = arith.constant 0 : i32
    %c0_i32_0 = arith.constant 0 : i32
    %c0_i32_1 = arith.constant 0 : i32
    return %c0_i32, %c0_i32_0 : i32, i32
  }
  func.func @transform_4(%arg0: i32) -> (i32, i32) {
    %c0_i32 = arith.constant 0 : i32
    %c0_i32_0 = arith.constant 0 : i32
    %c0_i32_1 = arith.constant 0 : i32
    return %c0_i32, %c0_i32_0 : i32, i32
  }
  func.func @transform_5(%arg0: i32) -> (i32, i32) {
    %c0_i32 = arith.constant 0 : i32
    %c0_i32_0 = arith.constant 0 : i32
    %c0_i32_1 = arith.constant 0 : i32
    return %c0_i32, %c0_i32_0 : i32, i32
  }
}

module attributes {stable_mosaic.version = 11 : i64} {
  func.func @_lstm_kernel(%arg0: i32, %arg1: memref<8x2x128xf32, #tpu.memory_space<vmem>>, %arg2: memref<32x128xf32, #tpu.memory_space<vmem>>, %arg3: memref<8x2x32xf32, #tpu.memory_space<vmem>>, %arg4: memref<2x32xf32, #tpu.memory_space<vmem>>) attributes {dimension_semantics = [#tpu.dimension_semantics<arbitrary>], iteration_bounds = array<i64: 1>, scalar_prefetch = 0 : i64, scratch_operands = 0 : i64, tpu.core_type = #tpu.core_type<tc>, window_params = [{pipeline_mode = #tpu.pipeline_mode<synchronous>, transform_indices = @transform_0, window_bounds = array<i64: 8, 2, 128>}, {pipeline_mode = #tpu.pipeline_mode<synchronous>, transform_indices = @transform_1, window_bounds = array<i64: 32, 128>}, {pipeline_mode = #tpu.pipeline_mode<synchronous>, transform_indices = @transform_2, window_bounds = array<i64: 8, 2, 32>}, {pipeline_mode = #tpu.pipeline_mode<synchronous>, transform_indices = @transform_3, window_bounds = array<i64: 2, 32>}]} {
    %c0 = arith.constant 0 : index
    %c0_0 = arith.constant 0 : index
    %0 = vector.load %arg2[%c0, %c0_0] : memref<32x128xf32, #tpu.memory_space<vmem>>, vector<32x128xf32>
    %cst = arith.constant 0.000000e+00 : f32
    %1 = vector.broadcast %cst : f32 to vector<2x32xf32>
    %cst_1 = arith.constant 0.000000e+00 : f32
    %2 = vector.broadcast %cst_1 : f32 to vector<2x32xf32>
    %c0_2 = arith.constant 0 : index
    %c0_3 = arith.constant 0 : index
    %c0_4 = arith.constant 0 : index
    %3 = vector.load %arg1[%c0_2, %c0_3, %c0_4] : memref<8x2x128xf32, #tpu.memory_space<vmem>>, vector<1x2x128xf32>
    %4 = vector.shape_cast %3 : vector<1x2x128xf32> to vector<2x128xf32>
    %cst_5 = arith.constant dense<0.000000e+00> : vector<2x128xf32>
    %5 = tpu.matmul %1, %0, %cst_5 {dimension_numbers = #tpu.dot_dimension_numbers<[1], [0], [0], [1], [0, 0, 1, 1], [], []>} : vector<2x32xf32>, vector<32x128xf32>, vector<2x128xf32> -> vector<2x128xf32>
    %6 = arith.addf %4, %5 : vector<2x128xf32>
    %7 = vector.extract_strided_slice %6 {offsets = [0, 0], sizes = [2, 32], strides = [1, 1]} : vector<2x128xf32> to vector<2x32xf32>
    %8 = arith.negf %7 : vector<2x32xf32>
    %9 = math.exp %8 : vector<2x32xf32>
    %cst_6 = arith.constant 1.000000e+00 : f32
    %10 = vector.broadcast %cst_6 : f32 to vector<2x32xf32>
    %11 = arith.addf %10, %9 : vector<2x32xf32>
    %12 = arith.divf %10, %11 : vector<2x32xf32>
    %13 = vector.extract_strided_slice %6 {offsets = [0, 32], sizes = [2, 32], strides = [1, 1]} : vector<2x128xf32> to vector<2x32xf32>
    %14 = arith.negf %13 : vector<2x32xf32>
    %15 = math.exp %14 : vector<2x32xf32>
    %cst_7 = arith.constant 1.000000e+00 : f32
    %16 = vector.broadcast %cst_7 : f32 to vector<2x32xf32>
    %17 = arith.addf %16, %15 : vector<2x32xf32>
    %18 = arith.divf %16, %17 : vector<2x32xf32>
    %19 = vector.extract_strided_slice %6 {offsets = [0, 64], sizes = [2, 32], strides = [1, 1]} : vector<2x128xf32> to vector<2x32xf32>
    %20 = math.tanh %19 : vector<2x32xf32>
    %21 = vector.extract_strided_slice %6 {offsets = [0, 96], sizes = [2, 32], strides = [1, 1]} : vector<2x128xf32> to vector<2x32xf32>
    %22 = arith.negf %21 : vector<2x32xf32>
    %23 = math.exp %22 : vector<2x32xf32>
    %cst_8 = arith.constant 1.000000e+00 : f32
    %24 = vector.broadcast %cst_8 : f32 to vector<2x32xf32>
    %25 = arith.addf %24, %23 : vector<2x32xf32>
    %26 = arith.divf %24, %25 : vector<2x32xf32>
    %27 = arith.mulf %18, %2 : vector<2x32xf32>
    %28 = arith.mulf %12, %20 : vector<2x32xf32>
    %29 = arith.addf %27, %28 : vector<2x32xf32>
    %30 = math.tanh %29 : vector<2x32xf32>
    %31 = arith.mulf %26, %30 : vector<2x32xf32>
    %c0_9 = arith.constant 0 : index
    %c0_10 = arith.constant 0 : index
    %c0_11 = arith.constant 0 : index
    %32 = vector.load %arg3[%c0_9, %c0_10, %c0_11] : memref<8x2x32xf32, #tpu.memory_space<vmem>>, vector<1x2x32xf32>
    %33 = vector.shape_cast %32 : vector<1x2x32xf32> to vector<2x32xf32>
    %34 = vector.shape_cast %31 : vector<2x32xf32> to vector<1x2x32xf32>
    tpu.vector_store %arg3[%c0_9, %c0_10, %c0_11], %34 {strides = array<i32>} : memref<8x2x32xf32, #tpu.memory_space<vmem>>, vector<1x2x32xf32>,
    %c1 = arith.constant 1 : index
    %c0_12 = arith.constant 0 : index
    %c0_13 = arith.constant 0 : index
    %35 = vector.load %arg1[%c1, %c0_12, %c0_13] : memref<8x2x128xf32, #tpu.memory_space<vmem>>, vector<1x2x128xf32>
    %36 = vector.shape_cast %35 : vector<1x2x128xf32> to vector<2x128xf32>
    %cst_14 = arith.constant dense<0.000000e+00> : vector<2x128xf32>
    %37 = tpu.matmul %31, %0, %cst_14 {dimension_numbers = #tpu.dot_dimension_numbers<[1], [0], [0], [1], [0, 0, 1, 1], [], []>} : vector<2x32xf32>, vector<32x128xf32>, vector<2x128xf32> -> vector<2x128xf32>
    %38 = arith.addf %36, %37 : vector<2x128xf32>
    %39 = vector.extract_strided_slice %38 {offsets = [0, 0], sizes = [2, 32], strides = [1, 1]} : vector<2x128xf32> to vector<2x32xf32>
    %40 = arith.negf %39 : vector<2x32xf32>
    %41 = math.exp %40 : vector<2x32xf32>
    %cst_15 = arith.constant 1.000000e+00 : f32
    %42 = vector.broadcast %cst_15 : f32 to vector<2x32xf32>
    %43 = arith.addf %42, %41 : vector<2x32xf32>
    %44 = arith.divf %42, %43 : vector<2x32xf32>
    %45 = vector.extract_strided_slice %38 {offsets = [0, 32], sizes = [2, 32], strides = [1, 1]} : vector<2x128xf32> to vector<2x32xf32>
    %46 = arith.negf %45 : vector<2x32xf32>
    %47 = math.exp %46 : vector<2x32xf32>
    %cst_16 = arith.constant 1.000000e+00 : f32
    %48 = vector.broadcast %cst_16 : f32 to vector<2x32xf32>
    %49 = arith.addf %48, %47 : vector<2x32xf32>
    %50 = arith.divf %48, %49 : vector<2x32xf32>
    %51 = vector.extract_strided_slice %38 {offsets = [0, 64], sizes = [2, 32], strides = [1, 1]} : vector<2x128xf32> to vector<2x32xf32>
    %52 = math.tanh %51 : vector<2x32xf32>
    %53 = vector.extract_strided_slice %38 {offsets = [0, 96], sizes = [2, 32], strides = [1, 1]} : vector<2x128xf32> to vector<2x32xf32>
    %54 = arith.negf %53 : vector<2x32xf32>
    %55 = math.exp %54 : vector<2x32xf32>
    %cst_17 = arith.constant 1.000000e+00 : f32
    %56 = vector.broadcast %cst_17 : f32 to vector<2x32xf32>
    %57 = arith.addf %56, %55 : vector<2x32xf32>
    %58 = arith.divf %56, %57 : vector<2x32xf32>
    %59 = arith.mulf %50, %29 : vector<2x32xf32>
    %60 = arith.mulf %44, %52 : vector<2x32xf32>
    %61 = arith.addf %59, %60 : vector<2x32xf32>
    %62 = math.tanh %61 : vector<2x32xf32>
    %63 = arith.mulf %58, %62 : vector<2x32xf32>
    %c1_18 = arith.constant 1 : index
    %c0_19 = arith.constant 0 : index
    %c0_20 = arith.constant 0 : index
    %64 = vector.load %arg3[%c1_18, %c0_19, %c0_20] : memref<8x2x32xf32, #tpu.memory_space<vmem>>, vector<1x2x32xf32>
    %65 = vector.shape_cast %64 : vector<1x2x32xf32> to vector<2x32xf32>
    %66 = vector.shape_cast %63 : vector<2x32xf32> to vector<1x2x32xf32>
    tpu.vector_store %arg3[%c1_18, %c0_19, %c0_20], %66 {strides = array<i32>} : memref<8x2x32xf32, #tpu.memory_space<vmem>>, vector<1x2x32xf32>,
    %c2 = arith.constant 2 : index
    %c0_21 = arith.constant 0 : index
    %c0_22 = arith.constant 0 : index
    %67 = vector.load %arg1[%c2, %c0_21, %c0_22] : memref<8x2x128xf32, #tpu.memory_space<vmem>>, vector<1x2x128xf32>
    %68 = vector.shape_cast %67 : vector<1x2x128xf32> to vector<2x128xf32>
    %cst_23 = arith.constant dense<0.000000e+00> : vector<2x128xf32>
    %69 = tpu.matmul %63, %0, %cst_23 {dimension_numbers = #tpu.dot_dimension_numbers<[1], [0], [0], [1], [0, 0, 1, 1], [], []>} : vector<2x32xf32>, vector<32x128xf32>, vector<2x128xf32> -> vector<2x128xf32>
    %70 = arith.addf %68, %69 : vector<2x128xf32>
    %71 = vector.extract_strided_slice %70 {offsets = [0, 0], sizes = [2, 32], strides = [1, 1]} : vector<2x128xf32> to vector<2x32xf32>
    %72 = arith.negf %71 : vector<2x32xf32>
    %73 = math.exp %72 : vector<2x32xf32>
    %cst_24 = arith.constant 1.000000e+00 : f32
    %74 = vector.broadcast %cst_24 : f32 to vector<2x32xf32>
    %75 = arith.addf %74, %73 : vector<2x32xf32>
    %76 = arith.divf %74, %75 : vector<2x32xf32>
    %77 = vector.extract_strided_slice %70 {offsets = [0, 32], sizes = [2, 32], strides = [1, 1]} : vector<2x128xf32> to vector<2x32xf32>
    %78 = arith.negf %77 : vector<2x32xf32>
    %79 = math.exp %78 : vector<2x32xf32>
    %cst_25 = arith.constant 1.000000e+00 : f32
    %80 = vector.broadcast %cst_25 : f32 to vector<2x32xf32>
    %81 = arith.addf %80, %79 : vector<2x32xf32>
    %82 = arith.divf %80, %81 : vector<2x32xf32>
    %83 = vector.extract_strided_slice %70 {offsets = [0, 64], sizes = [2, 32], strides = [1, 1]} : vector<2x128xf32> to vector<2x32xf32>
    %84 = math.tanh %83 : vector<2x32xf32>
    %85 = vector.extract_strided_slice %70 {offsets = [0, 96], sizes = [2, 32], strides = [1, 1]} : vector<2x128xf32> to vector<2x32xf32>
    %86 = arith.negf %85 : vector<2x32xf32>
    %87 = math.exp %86 : vector<2x32xf32>
    %cst_26 = arith.constant 1.000000e+00 : f32
    %88 = vector.broadcast %cst_26 : f32 to vector<2x32xf32>
    %89 = arith.addf %88, %87 : vector<2x32xf32>
    %90 = arith.divf %88, %89 : vector<2x32xf32>
    %91 = arith.mulf %82, %61 : vector<2x32xf32>
    %92 = arith.mulf %76, %84 : vector<2x32xf32>
    %93 = arith.addf %91, %92 : vector<2x32xf32>
    %94 = math.tanh %93 : vector<2x32xf32>
    %95 = arith.mulf %90, %94 : vector<2x32xf32>
    %c2_27 = arith.constant 2 : index
    %c0_28 = arith.constant 0 : index
    %c0_29 = arith.constant 0 : index
    %96 = vector.load %arg3[%c2_27, %c0_28, %c0_29] : memref<8x2x32xf32, #tpu.memory_space<vmem>>, vector<1x2x32xf32>
    %97 = vector.shape_cast %96 : vector<1x2x32xf32> to vector<2x32xf32>
    %98 = vector.shape_cast %95 : vector<2x32xf32> to vector<1x2x32xf32>
    tpu.vector_store %arg3[%c2_27, %c0_28, %c0_29], %98 {strides = array<i32>} : memref<8x2x32xf32, #tpu.memory_space<vmem>>, vector<1x2x32xf32>,
    %c3 = arith.constant 3 : index
    %c0_30 = arith.constant 0 : index
    %c0_31 = arith.constant 0 : index
    %99 = vector.load %arg1[%c3, %c0_30, %c0_31] : memref<8x2x128xf32, #tpu.memory_space<vmem>>, vector<1x2x128xf32>
    %100 = vector.shape_cast %99 : vector<1x2x128xf32> to vector<2x128xf32>
    %cst_32 = arith.constant dense<0.000000e+00> : vector<2x128xf32>
    %101 = tpu.matmul %95, %0, %cst_32 {dimension_numbers = #tpu.dot_dimension_numbers<[1], [0], [0], [1], [0, 0, 1, 1], [], []>} : vector<2x32xf32>, vector<32x128xf32>, vector<2x128xf32> -> vector<2x128xf32>
    %102 = arith.addf %100, %101 : vector<2x128xf32>
    %103 = vector.extract_strided_slice %102 {offsets = [0, 0], sizes = [2, 32], strides = [1, 1]} : vector<2x128xf32> to vector<2x32xf32>
    %104 = arith.negf %103 : vector<2x32xf32>
    %105 = math.exp %104 : vector<2x32xf32>
    %cst_33 = arith.constant 1.000000e+00 : f32
    %106 = vector.broadcast %cst_33 : f32 to vector<2x32xf32>
    %107 = arith.addf %106, %105 : vector<2x32xf32>
    %108 = arith.divf %106, %107 : vector<2x32xf32>
    %109 = vector.extract_strided_slice %102 {offsets = [0, 32], sizes = [2, 32], strides = [1, 1]} : vector<2x128xf32> to vector<2x32xf32>
    %110 = arith.negf %109 : vector<2x32xf32>
    %111 = math.exp %110 : vector<2x32xf32>
    %cst_34 = arith.constant 1.000000e+00 : f32
    %112 = vector.broadcast %cst_34 : f32 to vector<2x32xf32>
    %113 = arith.addf %112, %111 : vector<2x32xf32>
    %114 = arith.divf %112, %113 : vector<2x32xf32>
    %115 = vector.extract_strided_slice %102 {offsets = [0, 64], sizes = [2, 32], strides = [1, 1]} : vector<2x128xf32> to vector<2x32xf32>
    %116 = math.tanh %115 : vector<2x32xf32>
    %117 = vector.extract_strided_slice %102 {offsets = [0, 96], sizes = [2, 32], strides = [1, 1]} : vector<2x128xf32> to vector<2x32xf32>
    %118 = arith.negf %117 : vector<2x32xf32>
    %119 = math.exp %118 : vector<2x32xf32>
    %cst_35 = arith.constant 1.000000e+00 : f32
    %120 = vector.broadcast %cst_35 : f32 to vector<2x32xf32>
    %121 = arith.addf %120, %119 : vector<2x32xf32>
    %122 = arith.divf %120, %121 : vector<2x32xf32>
    %123 = arith.mulf %114, %93 : vector<2x32xf32>
    %124 = arith.mulf %108, %116 : vector<2x32xf32>
    %125 = arith.addf %123, %124 : vector<2x32xf32>
    %126 = math.tanh %125 : vector<2x32xf32>
    %127 = arith.mulf %122, %126 : vector<2x32xf32>
    %c3_36 = arith.constant 3 : index
    %c0_37 = arith.constant 0 : index
    %c0_38 = arith.constant 0 : index
    %128 = vector.load %arg3[%c3_36, %c0_37, %c0_38] : memref<8x2x32xf32, #tpu.memory_space<vmem>>, vector<1x2x32xf32>
    %129 = vector.shape_cast %128 : vector<1x2x32xf32> to vector<2x32xf32>
    %130 = vector.shape_cast %127 : vector<2x32xf32> to vector<1x2x32xf32>
    tpu.vector_store %arg3[%c3_36, %c0_37, %c0_38], %130 {strides = array<i32>} : memref<8x2x32xf32, #tpu.memory_space<vmem>>, vector<1x2x32xf32>,
    %c4 = arith.constant 4 : index
    %c0_39 = arith.constant 0 : index
    %c0_40 = arith.constant 0 : index
    %131 = vector.load %arg1[%c4, %c0_39, %c0_40] : memref<8x2x128xf32, #tpu.memory_space<vmem>>, vector<1x2x128xf32>
    %132 = vector.shape_cast %131 : vector<1x2x128xf32> to vector<2x128xf32>
    %cst_41 = arith.constant dense<0.000000e+00> : vector<2x128xf32>
    %133 = tpu.matmul %127, %0, %cst_41 {dimension_numbers = #tpu.dot_dimension_numbers<[1], [0], [0], [1], [0, 0, 1, 1], [], []>} : vector<2x32xf32>, vector<32x128xf32>, vector<2x128xf32> -> vector<2x128xf32>
    %134 = arith.addf %132, %133 : vector<2x128xf32>
    %135 = vector.extract_strided_slice %134 {offsets = [0, 0], sizes = [2, 32], strides = [1, 1]} : vector<2x128xf32> to vector<2x32xf32>
    %136 = arith.negf %135 : vector<2x32xf32>
    %137 = math.exp %136 : vector<2x32xf32>
    %cst_42 = arith.constant 1.000000e+00 : f32
    %138 = vector.broadcast %cst_42 : f32 to vector<2x32xf32>
    %139 = arith.addf %138, %137 : vector<2x32xf32>
    %140 = arith.divf %138, %139 : vector<2x32xf32>
    %141 = vector.extract_strided_slice %134 {offsets = [0, 32], sizes = [2, 32], strides = [1, 1]} : vector<2x128xf32> to vector<2x32xf32>
    %142 = arith.negf %141 : vector<2x32xf32>
    %143 = math.exp %142 : vector<2x32xf32>
    %cst_43 = arith.constant 1.000000e+00 : f32
    %144 = vector.broadcast %cst_43 : f32 to vector<2x32xf32>
    %145 = arith.addf %144, %143 : vector<2x32xf32>
    %146 = arith.divf %144, %145 : vector<2x32xf32>
    %147 = vector.extract_strided_slice %134 {offsets = [0, 64], sizes = [2, 32], strides = [1, 1]} : vector<2x128xf32> to vector<2x32xf32>
    %148 = math.tanh %147 : vector<2x32xf32>
    %149 = vector.extract_strided_slice %134 {offsets = [0, 96], sizes = [2, 32], strides = [1, 1]} : vector<2x128xf32> to vector<2x32xf32>
    %150 = arith.negf %149 : vector<2x32xf32>
    %151 = math.exp %150 : vector<2x32xf32>
    %cst_44 = arith.constant 1.000000e+00 : f32
    %152 = vector.broadcast %cst_44 : f32 to vector<2x32xf32>
    %153 = arith.addf %152, %151 : vector<2x32xf32>
    %154 = arith.divf %152, %153 : vector<2x32xf32>
    %155 = arith.mulf %146, %125 : vector<2x32xf32>
    %156 = arith.mulf %140, %148 : vector<2x32xf32>
    %157 = arith.addf %155, %156 : vector<2x32xf32>
    %158 = math.tanh %157 : vector<2x32xf32>
    %159 = arith.mulf %154, %158 : vector<2x32xf32>
    %c4_45 = arith.constant 4 : index
    %c0_46 = arith.constant 0 : index
    %c0_47 = arith.constant 0 : index
    %160 = vector.load %arg3[%c4_45, %c0_46, %c0_47] : memref<8x2x32xf32, #tpu.memory_space<vmem>>, vector<1x2x32xf32>
    %161 = vector.shape_cast %160 : vector<1x2x32xf32> to vector<2x32xf32>
    %162 = vector.shape_cast %159 : vector<2x32xf32> to vector<1x2x32xf32>
    tpu.vector_store %arg3[%c4_45, %c0_46, %c0_47], %162 {strides = array<i32>} : memref<8x2x32xf32, #tpu.memory_space<vmem>>, vector<1x2x32xf32>,
    %c5 = arith.constant 5 : index
    %c0_48 = arith.constant 0 : index
    %c0_49 = arith.constant 0 : index
    %163 = vector.load %arg1[%c5, %c0_48, %c0_49] : memref<8x2x128xf32, #tpu.memory_space<vmem>>, vector<1x2x128xf32>
    %164 = vector.shape_cast %163 : vector<1x2x128xf32> to vector<2x128xf32>
    %cst_50 = arith.constant dense<0.000000e+00> : vector<2x128xf32>
    %165 = tpu.matmul %159, %0, %cst_50 {dimension_numbers = #tpu.dot_dimension_numbers<[1], [0], [0], [1], [0, 0, 1, 1], [], []>} : vector<2x32xf32>, vector<32x128xf32>, vector<2x128xf32> -> vector<2x128xf32>
    %166 = arith.addf %164, %165 : vector<2x128xf32>
    %167 = vector.extract_strided_slice %166 {offsets = [0, 0], sizes = [2, 32], strides = [1, 1]} : vector<2x128xf32> to vector<2x32xf32>
    %168 = arith.negf %167 : vector<2x32xf32>
    %169 = math.exp %168 : vector<2x32xf32>
    %cst_51 = arith.constant 1.000000e+00 : f32
    %170 = vector.broadcast %cst_51 : f32 to vector<2x32xf32>
    %171 = arith.addf %170, %169 : vector<2x32xf32>
    %172 = arith.divf %170, %171 : vector<2x32xf32>
    %173 = vector.extract_strided_slice %166 {offsets = [0, 32], sizes = [2, 32], strides = [1, 1]} : vector<2x128xf32> to vector<2x32xf32>
    %174 = arith.negf %173 : vector<2x32xf32>
    %175 = math.exp %174 : vector<2x32xf32>
    %cst_52 = arith.constant 1.000000e+00 : f32
    %176 = vector.broadcast %cst_52 : f32 to vector<2x32xf32>
    %177 = arith.addf %176, %175 : vector<2x32xf32>
    %178 = arith.divf %176, %177 : vector<2x32xf32>
    %179 = vector.extract_strided_slice %166 {offsets = [0, 64], sizes = [2, 32], strides = [1, 1]} : vector<2x128xf32> to vector<2x32xf32>
    %180 = math.tanh %179 : vector<2x32xf32>
    %181 = vector.extract_strided_slice %166 {offsets = [0, 96], sizes = [2, 32], strides = [1, 1]} : vector<2x128xf32> to vector<2x32xf32>
    %182 = arith.negf %181 : vector<2x32xf32>
    %183 = math.exp %182 : vector<2x32xf32>
    %cst_53 = arith.constant 1.000000e+00 : f32
    %184 = vector.broadcast %cst_53 : f32 to vector<2x32xf32>
    %185 = arith.addf %184, %183 : vector<2x32xf32>
    %186 = arith.divf %184, %185 : vector<2x32xf32>
    %187 = arith.mulf %178, %157 : vector<2x32xf32>
    %188 = arith.mulf %172, %180 : vector<2x32xf32>
    %189 = arith.addf %187, %188 : vector<2x32xf32>
    %190 = math.tanh %189 : vector<2x32xf32>
    %191 = arith.mulf %186, %190 : vector<2x32xf32>
    %c5_54 = arith.constant 5 : index
    %c0_55 = arith.constant 0 : index
    %c0_56 = arith.constant 0 : index
    %192 = vector.load %arg3[%c5_54, %c0_55, %c0_56] : memref<8x2x32xf32, #tpu.memory_space<vmem>>, vector<1x2x32xf32>
    %193 = vector.shape_cast %192 : vector<1x2x32xf32> to vector<2x32xf32>
    %194 = vector.shape_cast %191 : vector<2x32xf32> to vector<1x2x32xf32>
    tpu.vector_store %arg3[%c5_54, %c0_55, %c0_56], %194 {strides = array<i32>} : memref<8x2x32xf32, #tpu.memory_space<vmem>>, vector<1x2x32xf32>,
    %c6 = arith.constant 6 : index
    %c0_57 = arith.constant 0 : index
    %c0_58 = arith.constant 0 : index
    %195 = vector.load %arg1[%c6, %c0_57, %c0_58] : memref<8x2x128xf32, #tpu.memory_space<vmem>>, vector<1x2x128xf32>
    %196 = vector.shape_cast %195 : vector<1x2x128xf32> to vector<2x128xf32>
    %cst_59 = arith.constant dense<0.000000e+00> : vector<2x128xf32>
    %197 = tpu.matmul %191, %0, %cst_59 {dimension_numbers = #tpu.dot_dimension_numbers<[1], [0], [0], [1], [0, 0, 1, 1], [], []>} : vector<2x32xf32>, vector<32x128xf32>, vector<2x128xf32> -> vector<2x128xf32>
    %198 = arith.addf %196, %197 : vector<2x128xf32>
    %199 = vector.extract_strided_slice %198 {offsets = [0, 0], sizes = [2, 32], strides = [1, 1]} : vector<2x128xf32> to vector<2x32xf32>
    %200 = arith.negf %199 : vector<2x32xf32>
    %201 = math.exp %200 : vector<2x32xf32>
    %cst_60 = arith.constant 1.000000e+00 : f32
    %202 = vector.broadcast %cst_60 : f32 to vector<2x32xf32>
    %203 = arith.addf %202, %201 : vector<2x32xf32>
    %204 = arith.divf %202, %203 : vector<2x32xf32>
    %205 = vector.extract_strided_slice %198 {offsets = [0, 32], sizes = [2, 32], strides = [1, 1]} : vector<2x128xf32> to vector<2x32xf32>
    %206 = arith.negf %205 : vector<2x32xf32>
    %207 = math.exp %206 : vector<2x32xf32>
    %cst_61 = arith.constant 1.000000e+00 : f32
    %208 = vector.broadcast %cst_61 : f32 to vector<2x32xf32>
    %209 = arith.addf %208, %207 : vector<2x32xf32>
    %210 = arith.divf %208, %209 : vector<2x32xf32>
    %211 = vector.extract_strided_slice %198 {offsets = [0, 64], sizes = [2, 32], strides = [1, 1]} : vector<2x128xf32> to vector<2x32xf32>
    %212 = math.tanh %211 : vector<2x32xf32>
    %213 = vector.extract_strided_slice %198 {offsets = [0, 96], sizes = [2, 32], strides = [1, 1]} : vector<2x128xf32> to vector<2x32xf32>
    %214 = arith.negf %213 : vector<2x32xf32>
    %215 = math.exp %214 : vector<2x32xf32>
    %cst_62 = arith.constant 1.000000e+00 : f32
    %216 = vector.broadcast %cst_62 : f32 to vector<2x32xf32>
    %217 = arith.addf %216, %215 : vector<2x32xf32>
    %218 = arith.divf %216, %217 : vector<2x32xf32>
    %219 = arith.mulf %210, %189 : vector<2x32xf32>
    %220 = arith.mulf %204, %212 : vector<2x32xf32>
    %221 = arith.addf %219, %220 : vector<2x32xf32>
    %222 = math.tanh %221 : vector<2x32xf32>
    %223 = arith.mulf %218, %222 : vector<2x32xf32>
    %c6_63 = arith.constant 6 : index
    %c0_64 = arith.constant 0 : index
    %c0_65 = arith.constant 0 : index
    %224 = vector.load %arg3[%c6_63, %c0_64, %c0_65] : memref<8x2x32xf32, #tpu.memory_space<vmem>>, vector<1x2x32xf32>
    %225 = vector.shape_cast %224 : vector<1x2x32xf32> to vector<2x32xf32>
    %226 = vector.shape_cast %223 : vector<2x32xf32> to vector<1x2x32xf32>
    tpu.vector_store %arg3[%c6_63, %c0_64, %c0_65], %226 {strides = array<i32>} : memref<8x2x32xf32, #tpu.memory_space<vmem>>, vector<1x2x32xf32>,
    %c7 = arith.constant 7 : index
    %c0_66 = arith.constant 0 : index
    %c0_67 = arith.constant 0 : index
    %227 = vector.load %arg1[%c7, %c0_66, %c0_67] : memref<8x2x128xf32, #tpu.memory_space<vmem>>, vector<1x2x128xf32>
    %228 = vector.shape_cast %227 : vector<1x2x128xf32> to vector<2x128xf32>
    %cst_68 = arith.constant dense<0.000000e+00> : vector<2x128xf32>
    %229 = tpu.matmul %223, %0, %cst_68 {dimension_numbers = #tpu.dot_dimension_numbers<[1], [0], [0], [1], [0, 0, 1, 1], [], []>} : vector<2x32xf32>, vector<32x128xf32>, vector<2x128xf32> -> vector<2x128xf32>
    %230 = arith.addf %228, %229 : vector<2x128xf32>
    %231 = vector.extract_strided_slice %230 {offsets = [0, 0], sizes = [2, 32], strides = [1, 1]} : vector<2x128xf32> to vector<2x32xf32>
    %232 = arith.negf %231 : vector<2x32xf32>
    %233 = math.exp %232 : vector<2x32xf32>
    %cst_69 = arith.constant 1.000000e+00 : f32
    %234 = vector.broadcast %cst_69 : f32 to vector<2x32xf32>
    %235 = arith.addf %234, %233 : vector<2x32xf32>
    %236 = arith.divf %234, %235 : vector<2x32xf32>
    %237 = vector.extract_strided_slice %230 {offsets = [0, 32], sizes = [2, 32], strides = [1, 1]} : vector<2x128xf32> to vector<2x32xf32>
    %238 = arith.negf %237 : vector<2x32xf32>
    %239 = math.exp %238 : vector<2x32xf32>
    %cst_70 = arith.constant 1.000000e+00 : f32
    %240 = vector.broadcast %cst_70 : f32 to vector<2x32xf32>
    %241 = arith.addf %240, %239 : vector<2x32xf32>
    %242 = arith.divf %240, %241 : vector<2x32xf32>
    %243 = vector.extract_strided_slice %230 {offsets = [0, 64], sizes = [2, 32], strides = [1, 1]} : vector<2x128xf32> to vector<2x32xf32>
    %244 = math.tanh %243 : vector<2x32xf32>
    %245 = vector.extract_strided_slice %230 {offsets = [0, 96], sizes = [2, 32], strides = [1, 1]} : vector<2x128xf32> to vector<2x32xf32>
    %246 = arith.negf %245 : vector<2x32xf32>
    %247 = math.exp %246 : vector<2x32xf32>
    %cst_71 = arith.constant 1.000000e+00 : f32
    %248 = vector.broadcast %cst_71 : f32 to vector<2x32xf32>
    %249 = arith.addf %248, %247 : vector<2x32xf32>
    %250 = arith.divf %248, %249 : vector<2x32xf32>
    %251 = arith.mulf %242, %221 : vector<2x32xf32>
    %252 = arith.mulf %236, %244 : vector<2x32xf32>
    %253 = arith.addf %251, %252 : vector<2x32xf32>
    %254 = math.tanh %253 : vector<2x32xf32>
    %255 = arith.mulf %250, %254 : vector<2x32xf32>
    %c7_72 = arith.constant 7 : index
    %c0_73 = arith.constant 0 : index
    %c0_74 = arith.constant 0 : index
    %256 = vector.load %arg3[%c7_72, %c0_73, %c0_74] : memref<8x2x32xf32, #tpu.memory_space<vmem>>, vector<1x2x32xf32>
    %257 = vector.shape_cast %256 : vector<1x2x32xf32> to vector<2x32xf32>
    %258 = vector.shape_cast %255 : vector<2x32xf32> to vector<1x2x32xf32>
    tpu.vector_store %arg3[%c7_72, %c0_73, %c0_74], %258 {strides = array<i32>} : memref<8x2x32xf32, #tpu.memory_space<vmem>>, vector<1x2x32xf32>,
    %c0_75 = arith.constant 0 : index
    %c0_76 = arith.constant 0 : index
    %259 = vector.load %arg4[%c0_75, %c0_76] : memref<2x32xf32, #tpu.memory_space<vmem>>, vector<2x32xf32>
    tpu.vector_store %arg4[%c0_75, %c0_76], %255 {strides = array<i32>} : memref<2x32xf32, #tpu.memory_space<vmem>>, vector<2x32xf32>,
    return
  }
  func.func @transform_0(%arg0: i32) -> (i32, i32, i32) {
    %c0_i32 = arith.constant 0 : i32
    %c0_i32_0 = arith.constant 0 : i32
    %c0_i32_1 = arith.constant 0 : i32
    %c0_i32_2 = arith.constant 0 : i32
    return %c0_i32, %c0_i32_0, %c0_i32_1 : i32, i32, i32
  }
  func.func @transform_1(%arg0: i32) -> (i32, i32) {
    %c0_i32 = arith.constant 0 : i32
    %c0_i32_0 = arith.constant 0 : i32
    %c0_i32_1 = arith.constant 0 : i32
    return %c0_i32, %c0_i32_0 : i32, i32
  }
  func.func @transform_2(%arg0: i32) -> (i32, i32, i32) {
    %c0_i32 = arith.constant 0 : i32
    %c0_i32_0 = arith.constant 0 : i32
    %c0_i32_1 = arith.constant 0 : i32
    %c0_i32_2 = arith.constant 0 : i32
    return %c0_i32, %c0_i32_0, %c0_i32_1 : i32, i32, i32
  }
  func.func @transform_3(%arg0: i32) -> (i32, i32) {
    %c0_i32 = arith.constant 0 : i32
    %c0_i32_0 = arith.constant 0 : i32
    %c0_i32_1 = arith.constant 0 : i32
    return %c0_i32, %c0_i32_0 : i32, i32
  }
}

</mosaic_0001>

<bundles_post_ra>
// kernel: encoder_block_forward.6
= control target key start
LH: loop header
LB: loop body
LE: loop exit
PB: predicated region body
PF: predicated region fallthrough
CT: control target
= control target key end

     0   :  { %vm30_vm0 = vcmask 261120   ;;  %s195_s1 = inlined_call_operand.vmem [shape: f32[32,32], index: 1, kind: input, shape index: {}]   ;;  %s196_s3 = inlined_call_operand.vmem [shape: f32[32,128], index: 3, kind: input, shape index: {}]   ;;  %s197_s2 = inlined_call_operand.vmem [shape: f32[1,32], index: 2, kind: input, shape index: {}]   ;;  %s198_s0 = inlined_call_operand.vmem [shape: f32[16,32], index: 0, kind: input, shape index: {}]   ;;  %s199_s4 = inlined_call_operand.vmem [shape: f32[16,128], index: 4, kind: input, shape index: {}]   ;;  %s200_s5 = inlined_call_operand.vmem [shape: f32[16,128], index: 5, kind: output, shape index: {}]  }
   0x1   :  { %v25_v0 = vld [vmem:[%s195_s1 + $0x18] sm:$0xff]  ;;  %v24_v1 = vld [vmem:[%s195_s1 + $0x10] sm:$0xff]  ;;  %v23_v2 = vld [vmem:[%s195_s1 + $0x8] sm:$0xff] }
   0x2   :  { %107 = vmatpush.msra.mxu2 %v25_v0  ;;  %49 = vmatpush.msra.mxu0 %v25_v0  ;;  %v65_v3 = vld [vmem:[%s196_s3 + $0x18] sm:$0xff]  ;;  %v64_v4 = vld [vmem:[%s196_s3 + $0x10] sm:$0xff]  ;;  %v22_v5 = vld [vmem:[%s195_s1] sm:$0xff] }
   0x3   :  { %111 = vmatpush.msra.mxu3 %v65_v3  ;;  %84 = vmatpush.msra.mxu1 %v65_v3  ;;  %v21_v6 = vld [vmem:[%s198_s0 + $0x8] sm:$0xff]  ;;  %v20_v7 = vld [vmem:[%s198_s0] sm:$0xff] }
   0x4   :  { %108 = vmatpush.msra.mxu2 %v24_v1  ;;  %50 = vmatpush.msra.mxu0 %v24_v1  ;;  %v63_v8 = vld [vmem:[%s196_s3 + $0x8] sm:$0xff]  ;;  %v62_v9 = vld [vmem:[%s196_s3] sm:$0xff] }
   0x5   :  { %112 = vmatpush.msra.mxu3 %v64_v4  ;;  %85 = vmatpush.msra.mxu1 %v64_v4  ;;  %v115_v10 = vld [vmem:[%s197_s2] ss:$0 sm:$0xff]  ;;  %v61_v18 = vld [vmem:[%s199_s4 + $0x8] sm:$0xff] }
   0x6   :  { %109 = vmatpush.msra.mxu2 %v23_v2  ;;  %51 = vmatpush.msra.mxu0 %v23_v2  ;;  %v60_v15 = vld [vmem:[%s199_s4] sm:$0xff] }
   0x7   :  { %113 = vmatpush.msra.mxu3 %v63_v8  ;;  %86 = vmatpush.msra.mxu1 %v63_v8 }
   0x8   :  { %110 = vmatpush.msra.mxu2 %v22_v5  ;;  %52 = vmatpush.msra.mxu0 %v22_v5 }
   0x9   :  { %104 = vmatmul.msk.f32.vlgmr.msra.gmra.mxu2 %vm30_vm0, %v21_v6  ;;  %103 = vmatmul.msk.f32.vlgmr.msra.gmra.mxu0 %vm30_vm0, %v20_v7 }
   0xa   :  { %114 = vmatpush.msra.mxu3 %v62_v9  ;;  %87 = vmatpush.msra.mxu1 %v62_v9 }
  0x86   :  { %v54_v11 = vpop.f32.mrf.mxu0 }
  0x87   :  { %v55_v12 = vadd.f32 %v115_v10, %v54_v11 }
  0x89   :  { %105 = vmatmul.msk.f32.vlgmr.msra.gmra.mxu1 %vm30_vm0, %v55_v12 }
  0x8c   :  { %v57_v13 = vpop.f32.mrf.mxu2 }
  0x8d   :  { %v58_v14 = vadd.f32 %v115_v10, %v57_v13 }
  0x8f   :  { %106 = vmatmul.msk.f32.vlgmr.msra.gmra.mxu3 %vm30_vm0, %v58_v14 }
 0x106   :  { %v89_v16 = vpop.f32.mrf.mxu1 }
 0x107   :  { %v95_v17 = vadd.f32 %v89_v16, %v60_v15 }
 0x109   :  { %97 = vst [vmem:[%s200_s5] sm:$0xff] %v95_v17 }
 0x112   :  { %v92_v19 = vpop.f32.mrf.mxu3 }
 0x113   :  { %v96_v20 = vadd.f32 %v92_v19, %v61_v18 }
 0x115   :  { %98 = vst [vmem:[%s200_s5 + $0x8] sm:$0xff] %v96_v20 }

// kernel: encoder_block_forward.4
= control target key start
LH: loop header
LB: loop body
LE: loop exit
PB: predicated region body
PF: predicated region fallthrough
CT: control target
= control target key end

     0   :  { %8 = vsyncpa [#allocation3], 0  ;;  %s243_s0 = inlined_call_operand.hbm [shape: f32[16,32], index: 0, kind: input, shape index: {}]   ;;  %s244_s1 = inlined_call_operand.hbm [shape: f32[32,224], index: 1, kind: input, shape index: {}]   ;;  %s245_s2 = inlined_call_operand.vmem [shape: f32[1,224], index: 2, kind: input, shape index: {}]   ;;  %s246_s3 = inlined_call_operand.vmem [shape: f32[16,224], index: 3, kind: output, shape index: {}]  }
   0x1   :  { %s14_s14 = sshll.u32 %s243_s0, 4  ;;  %s15_s14 = int_to_ptr.hbm [resolvable:$true] %s14_s14 }
   0x2   :  { %9 = vsyncpa [#allocation5], 0  ;;  %s196_s15 = smov [#allocation2]   ;;  %s27_s19 = sshll.u32 %s244_s1, 4  ;;  %s28_s19 = int_to_ptr.hbm [resolvable:$true] %s27_s19 }
   0x3   :  { %s16_s16 = sshll.u32 %s196_s15, 4  ;;  %s197_s20 = smov 128   ;;  %s17_s16 = int_to_ptr.vmem [resolvable:$true] %s16_s16 }
   0x4   :  { %s198_s21 = smov 8   ;;  %s199_s22 = smov [#allocation4]  }
   0x5   :  { %22 = dma.hbm_to_vmem [thread:$0]  %s15_s14, 256, %s17_s16, [#allocation3], %s197_s20, %s197_s20, %s198_s21  }
   0x6   :  { %s29_s23 = sshll.u32 %s199_s22, 4  ;;  %s200_s24 = smov 256   ;;  %s30_s23 = int_to_ptr.vmem [resolvable:$true] %s29_s23 }
   0x7   :  { %s201_s25 = smov 16  }
   0x8   :  { %35 = dma.hbm_to_vmem [thread:$0]  %s28_s19, 1024, %s30_s23, [#allocation5], %s200_s24, %s200_s24, %s201_s25  }
   0x9   :  { %192 = dma.done.wait [#allocation3], 256  }
   0xa   :  { %193 = vsyncadd [#allocation3], 4294967040 }
   0xb   :  { %194 = dma.done.wait [#allocation5], 1024  }
   0xc   :  { %195 = vsyncadd [#allocation5], 4294966272  ;;  %v54_v0 = vld [vmem:[#allocation4 + $0x30] sm:$0xff]  ;;  %v55_v1 = vld [vmem:[#allocation4 + $0x38] sm:$0xff]  ;;  %vm62_vm0 = vcmask 261120   ;;  %vm116_vm1 = vcmask 785408  }
   0xd   :  { %v52_v2 = vld [vmem:[#allocation4 + $0x20] sm:$0xff]  ;;  %130 = vmatpush.msra.mxu2 %v54_v0  ;;  %134 = vmatpush.msra.mxu3 %v55_v1  ;;  %v53_v3 = vld [vmem:[#allocation4 + $0x28] sm:$0xff]  ;;  %v50_v4 = vld [vmem:[#allocation4 + $0x10] sm:$0xff] }
   0xe   :  { %v51_v5 = vld [vmem:[#allocation4 + $0x18] sm:$0xff]  ;;  %81 = vmatpush.msra.mxu0 %v54_v0  ;;  %104 = vmatpush.msra.mxu1 %v55_v1  ;;  %v48_v6 = vld [vmem:[#allocation4] sm:$0xff]  ;;  %v49_v7 = vld [vmem:[#allocation4 + $0x8] sm:$0xff] }
   0xf   :  { %131 = vmatpush.msra.mxu2 %v52_v2  ;;  %135 = vmatpush.msra.mxu3 %v53_v3  ;;  %v47_v8 = vld [vmem:[#allocation2 + $0x8] sm:$0xff]  ;;  %v46_v9 = vld [vmem:[#allocation2] sm:$0xff] }
  0x10   :  { %82 = vmatpush.msra.mxu0 %v52_v2  ;;  %105 = vmatpush.msra.mxu1 %v53_v3  ;;  %v56_v10 = vld [vmem:[%s245_s2] sm:$0x3] }
  0x11   :  { %132 = vmatpush.msra.mxu2 %v50_v4  ;;  %136 = vmatpush.msra.mxu3 %v51_v5  ;;  %v58_v11 = vperm.slane %v56_v10, 0  ;;  %v59_v12 = vperm.slane %v56_v10, 1 }
  0x12   :  { %83 = vmatpush.msra.mxu0 %v50_v4  ;;  %106 = vmatpush.msra.mxu1 %v51_v5 }
  0x13   :  { %133 = vmatpush.msra.mxu2 %v48_v6  ;;  %137 = vmatpush.msra.mxu3 %v49_v7 }
  0x14   :  { %127 = vmatmul.msk.f32.vlgmr.msra.gmra.mxu2 %vm62_vm0, %v47_v8  ;;  %129 = vmatmul.msk.f32.vlgmr.msra.gmra.mxu3 %vm62_vm0, %v47_v8 }
  0x15   :  { %84 = vmatpush.msra.mxu0 %v48_v6  ;;  %107 = vmatpush.msra.mxu1 %v49_v7 }
  0x16   :  { %126 = vmatmul.msk.f32.vlgmr.msra.gmra.mxu0 %vm62_vm0, %v46_v9  ;;  %128 = vmatmul.msk.f32.vlgmr.msra.gmra.mxu1 %vm62_vm0, %v46_v9 }
  0x93   :  { %v86_v13 = vpop.f32.mrf.mxu0  ;;  %v109_v14 = vpop.f32.mrf.mxu1 }
  0x94   :  { %v87_v15 = vadd.f32 %v86_v13, %v58_v11  ;;  %v110_v16 = vadd.f32 %v109_v14, %v59_v12 }
  0x96   :  { %115 = vst [vmem:[%s246_s3] sm:$0xff] %v87_v15 }
  0x97   :  { %v89_v17 = vpop.f32.mrf.mxu2  ;;  %117 = vst.msk [vmem:[%s246_s3 + $0x8] sm:$0xff] %vm116_vm1, %v110_v16  ;;  %v112_v18 = vpop.f32.mrf.mxu3 }
  0x98   :  { %v90_v19 = vadd.f32 %v89_v17, %v58_v11  ;;  %v113_v20 = vadd.f32 %v112_v18, %v59_v12 }
  0x9a   :  { %118 = vst [vmem:[%s246_s3 + $0x10] sm:$0xff] %v90_v19 }
  0x9b   :  { %119 = vst.msk [vmem:[%s246_s3 + $0x18] sm:$0xff] %vm116_vm1, %v113_v20 }
  0x9c   :  { %124 = vsyncpa [#allocation3], 1 }
  0x9d   :  { %125 = vsyncpa [#allocation5], 1 }

// kernel: encoder_block_forward.5
= control target key start
LH: loop header
LB: loop body
LE: loop exit
PB: predicated region body
PF: predicated region fallthrough
CT: control target
= control target key end

     0   :  { %10 = vsyncpa [#allocation3], 0  ;;  %s964_s0 = inlined_call_operand.vmem [shape: f32[2,4,8,8], index: 0, kind: input, shape index: {}]   ;;  %s965_s1 = inlined_call_operand.vmem [shape: f32[2,4,8,8], index: 1, kind: input, shape index: {}]   ;;  %s966_s2 = inlined_call_operand.vmem [shape: f32[2,4,8,8], index: 2, kind: input, shape index: {}]   ;;  %s967_s3 = inlined_call_operand.vmem [shape: f32[2,4,8,8], index: 3, kind: output, shape index: {0}]   ;;  %s968_s4 = inlined_call_operand.hbm [shape: f32[2,4,8,8], index: 4, kind: output, shape index: {1}]  }
   0x1   :  { %12 = vsyncpa [#allocation3 + $0x1], 0  ;;  %s832_s15 = smov 0   ;;  %s834_s16 = smov 0  }
   0x2   :  { %s836_s17 = smov 0   ;;  %s838_s18 = smov 0  }
   0x3 LB: > { %s853_s19 = sadd.s32 4294967295, %s803_s18   ;;  %s649_s20 = sadd.s32 4294967294, %s803_s18   ;;  %s803_s18 = sphi %s838_s18, %s974_s18   ;;  %s799_s17 = sphi %s836_s17, %s973_s17   ;;  %s795_s16 = sphi %s834_s16, %s972_s16   ;;  %s791_s15 = sphi %s832_s15, %s971_s15  }
   0x4   : > { %s857_s21 = sadd.s32 1, %s803_s18   ;;  %s129_s22 = sadd.s32 1, %s799_s17 }
   0x5   : > { %s126_s23 = ssub.s32 %s803_s18, %s857_s21  ;;  %p139_p0 = scmp.ne.s32.totalorder %s799_s17, %s795_s16 }
   0x6   : > { %p127_p1 = scmp.eq.s32.totalorder %s126_s23, 0  ;;  %p140_p2 = scmp.eq.s32.totalorder %s853_s19, 1 }
   0x7   : > { %p145_p3 = scmp.ne.s32.totalorder %s795_s16, %s791_s15  ;;  %p146_p4 = scmp.eq.s32.totalorder %s649_s20, 1 }
   0x8   : > { %s868_s24 = scalar_select %p127_p1, %s799_s17, %s129_s22  }
   0x9   : > { %p870_p5 = por %p140_p2, %p139_p0  ;;  %p874_p6 = por %p146_p4, %p145_p3 }
   0xa   : > { %p652_p7 = scmp.ge.s32.totalorder %s803_s18, 1  ;;  %p188_p8 = scmp.lt.s32.totalorder %s803_s18, 3 }
   0xc   : > { %p189_p9 = pnand %p652_p7, %p188_p8 }
   0xd   : > { %p229_p10 = scmp.lt.s32.totalorder (!%p189_p9), %s853_s19, 1  ;;  %s226_s12 = sand.u32 (!%p189_p9), 1, %s795_s16  }
   0xe   : > { %192 = sbr.rel (%p189_p9) target bundleno = 556 (0x22c), region = 32  ;;  %s653_s13 = sshll.u32 (!%p189_p9), %s226_s12, 5 }
   0xf   : > { %s228_s14 = scalar_lea.vmem (!%p189_p9), [#allocation2], %s653_s13  ;;  %s683_s20 = sshll.u32 (!%p189_p9), %s853_s19, 5 }
  0x10   : > { %s535_s29 = sshll.u32 (!%p189_p9), %s228_s14, 4  ;;  %s536_s29 = int_to_ptr.vmem [resolvable:$true] %s535_s29 }
  0x13   : > { %s230_s27 = scalar_select %p229_p10, %s853_s19, 1  ;;  %vm261_vm0 = vcmask 64512  }
  0x14   : > { %s761_s19 = scalar_lea.hbm %s968_s4, 64 }
  0x15   : > { %s882_s28 = sshll.u32 %s230_s27, 5  ;;  %s534_s27 = scalar_lea.hbm %s968_s4, %s683_s20 }
  0x16   : > { %s238_s5 = scalar_lea.vmem %s965_s1, %s882_s28  ;;  %s233_s8 = scalar_lea.vmem %s964_s0, %s882_s28 }
  0x17   : > { %v253_v0 = vld [vmem:[%s238_s5] sm:$0xff]  ;;  %v255_v1 = vld [vmem:[%s238_s5 + $0x10] sm:$0xff]  ;;  %v254_v4 = vld [vmem:[%s238_s5 + $0x8] sm:$0xff]  ;;  %s243_s11 = scalar_lea.vmem %s966_s2, %s882_s28  ;;  %s537_s30 = sshll.u32 %s534_s27, 4  ;;  %s538_s30 = int_to_ptr.hbm [resolvable:$true] %s537_s30 }
  0x18   : > { %v249_v2 = vld [vmem:[%s233_s8] sm:$0xff]  ;;  %662 = vmatpush.xpose.msk.msra.mxu0 %vm261_vm0, %v253_v0  ;;  %666 = vmatpush.xpose.msk.msra.mxu2 %vm261_vm0, %v255_v1  ;;  %v251_v3 = vld [vmem:[%s233_s8 + $0x10] sm:$0xff]  ;;  %v256_v5 = vld [vmem:[%s238_s5 + $0x18] sm:$0xff]  ;;  %s520_s5 = scalar_lea.sflag [#allocation3], %s226_s12  ;;  %s755_s6 = sshra.s32 %s538_s30, 4  ;;  %s756_s6 = int_to_ptr.hbm [resolvable:$true] %s755_s6 }
  0x19   : > { %664 = vmatpush.xpose.msk.msra.mxu1 %vm261_vm0, %v254_v4  ;;  %668 = vmatpush.xpose.msk.msra.mxu3 %vm261_vm0, %v256_v5  ;;  %v250_v6 = vld [vmem:[%s233_s8 + $0x8] sm:$0xff]  ;;  %v252_v7 = vld [vmem:[%s233_s8 + $0x18] sm:$0xff]  ;;  %v257_v40 = vld [vmem:[%s243_s11] sm:$0xff]  ;;  %s757_s7 = scalar_lea.hbm %s756_s6, 32  ;;  %p762_p0 = scmp.lt.s32.totalorder %s756_s6, %s968_s4 }
  0x1a   : > { %v259_v41 = vld [vmem:[%s243_s11 + $0x10] sm:$0xff]  ;;  %v258_v42 = vld [vmem:[%s243_s11 + $0x8] sm:$0xff]  ;;  %v260_v43 = vld [vmem:[%s243_s11 + $0x18] sm:$0xff]  ;;  %p758_p11 = scmp.ne.s32.totalorder %s756_s6, %s757_s7  ;;  %p763_p1 = scmp.lt.s32.totalorder %s761_s19, %s757_s7 }
  0x1b   : > { %663 = vmatmul.msk.f32.vlgmr.msra.gmra.mxu0 %vm261_vm0, %v249_v2  ;;  %667 = vmatmul.msk.f32.vlgmr.msra.gmra.mxu2 %vm261_vm0, %v251_v3 }
  0x1c   : > { %665 = vmatmul.msk.f32.vlgmr.msra.gmra.mxu1 %vm261_vm0, %v250_v6  ;;  %669 = vmatmul.msk.f32.vlgmr.msra.gmra.mxu3 %vm261_vm0, %v252_v7  ;;  %p759_p12 = pnand %p758_p11, %p870_p5  ;;  %p764_p2 = por %p763_p1, %p762_p0 }
  0x1d   : > { %436 = vmatpush.msrb.mxu0 %v257_v40  ;;  %482 = vmatpush.msrb.mxu2 %v259_v41 }
  0x1e   : > { %459 = vmatpush.msrb.mxu1 %v258_v42  ;;  %505 = vmatpush.msrb.mxu3 %v260_v43  ;;  %p760_p13 = pneg %p759_p12 }
  0x20   : > { %p765_p3 = pnand %p764_p2, %p760_p13 }
  0x98   : > { %v285_v8 = vpop.f32.mrf.mxu0 }
  0x99   : > { %v366_v9 = vmul.f32 0.25, %v285_v8  ;;  %v311_v10 = vpop.f32.mrf.mxu1 }
  0x9a   : > { %v367_v12 = vmul.f32 0.25, %v311_v10 }
  0x9b   : > { %v370_v11 = vsel %vm261_vm0, %v366_v9, -inf }
  0x9c   : > { %371 = vmax.xlane.f32.xlu1 %v370_v11  ;;  %v373_v17 = vsel %vm261_vm0, %v367_v12, -inf }
  0x9e   : > { %v337_v13 = vpop.f32.mrf.mxu2 }
  0x9f   : > { %v368_v14 = vmul.f32 0.25, %v337_v13  ;;  %v363_v15 = vpop.f32.mrf.mxu3 }
  0xa0   : > { %v369_v18 = vmul.f32 0.25, %v363_v15 }
  0xa1   : > { %v376_v16 = vsel %vm261_vm0, %v368_v14, -inf }
  0xa2   : > { %377 = vmax.xlane.f32.xlu0 %v376_v16  ;;  %v379_v19 = vsel %vm261_vm0, %v369_v18, -inf }
  0xa4   : > { %374 = vmax.xlane.f32.xlu1 %v373_v17 }
  0xaa   : > { %380 = vmax.xlane.f32.xlu0 %v379_v19 }
 0x10f   : > { %v372_v20 = vpop.xlane.xlu1 %371 }
 0x110   : > { %v382_v21 = vsub.f32 %v366_v9, %v372_v20 }
 0x112   : > { %v386_v22 = vmul.f32 1.442695, %v382_v21 }
 0x114   : > { %725 = vpow2.f32 %v386_v22 }
 0x115   : > { %v378_v23 = vpop.xlane.xlu0 %377 }
 0x116   : > { %v384_v24 = vsub.f32 %v368_v14, %v378_v23 }
 0x117   : > { %v375_v25 = vpop.xlane.xlu1 %374 }
 0x118   : > { %v390_v26 = vmul.f32 1.442695, %v384_v24  ;;  %v383_v27 = vsub.f32 %v367_v12, %v375_v25 }
 0x11a   : > { %v726_v28 = vpop.eup %725  ;;  %727 = vpow2.f32 %v390_v26  ;;  %v388_v29 = vmul.f32 1.442695, %v383_v27 }
 0x11b   : > { %v394_v30 = vsel %vm261_vm0, %v726_v28, 0.0 }
 0x11c   : > { %729 = vpow2.f32 %v388_v29  ;;  %395 = vadd.xlane.f32.xlu0 %v394_v30 }
 0x11d   : > { %v381_v31 = vpop.xlane.xlu0 %380 }
 0x11e   : > { %v385_v32 = vsub.f32 %v369_v18, %v381_v31 }
 0x120   : > { %v728_v33 = vpop.eup %727  ;;  %v392_v34 = vmul.f32 1.442695, %v385_v32 }
 0x121   : > { %v400_v35 = vsel %vm261_vm0, %v728_v33, 0.0 }
 0x122   : > { %v730_v36 = vpop.eup %729  ;;  %731 = vpow2.f32 %v392_v34  ;;  %401 = vadd.xlane.f32.xlu2 %v400_v35 }
 0x123   : > { %v397_v37 = vsel %vm261_vm0, %v730_v36, 0.0 }
 0x124   : > { %398 = vadd.xlane.f32.xlu1 %v397_v37 }
 0x128   : > { %v732_v38 = vpop.eup %731 }
 0x129   : > { %v403_v39 = vsel %vm261_vm0, %v732_v38, 0.0 }
 0x12a   : > { %404 = vadd.xlane.f32.xlu2 %v403_v39 }
 0x18f   : > { %v396_v44 = vpop.xlane.xlu0 %395 }
 0x190   : > { %733 = vrcp.f32 %v396_v44 }
 0x195   : > { %v402_v45 = vpop.xlane.xlu2 %401 }
 0x196   : > { %v734_v46 = vpop.eup %733  ;;  %735 = vrcp.f32 %v402_v45 }
 0x197   : > { %v410_v47 = vmul.f32 %v734_v46, %v726_v28  ;;  %v399_v48 = vpop.xlane.xlu1 %398 }
 0x198   : > { %737 = vrcp.f32 %v399_v48 }
 0x199   : > { %414 = vst.msk [vmem:[%s228_s14] sm:$0xff] %vm261_vm0, %v410_v47  ;;  %670 = vmatmul.msk.f32.vlgmr.msrb.gmra.mxu0 %vm261_vm0, %v410_v47 }
 0x19c   : > { %v736_v49 = vpop.eup %735 }
 0x19d   : > { %v405_v50 = vpop.xlane.xlu2 %404  ;;  %v412_v51 = vmul.f32 %v736_v49, %v728_v33 }
 0x19e   : > { %v738_v52 = vpop.eup %737  ;;  %739 = vrcp.f32 %v405_v50 }
 0x19f   : > { %v411_v53 = vmul.f32 %v738_v52, %v730_v36  ;;  %416 = vst.msk [vmem:[%s228_s14 + $0x10] sm:$0xff] %vm261_vm0, %v412_v51  ;;  %672 = vmatmul.msk.f32.vlgmr.msrb.gmra.mxu2 %vm261_vm0, %v412_v51 }
 0x1a1   : > { %415 = vst.msk [vmem:[%s228_s14 + $0x8] sm:$0xff] %vm261_vm0, %v411_v53  ;;  %671 = vmatmul.msk.f32.vlgmr.msrb.gmra.mxu1 %vm261_vm0, %v411_v53 }
 0x1a4   : > { %v740_v54 = vpop.eup %739 }
 0x1a5   : > { %v413_v55 = vmul.f32 %v740_v54, %v732_v38 }
 0x1a7   : > { %417 = vst.msk [vmem:[%s228_s14 + $0x18] sm:$0xff] %vm261_vm0, %v413_v55  ;;  %673 = vmatmul.msk.f32.vlgmr.msrb.gmra.mxu3 %vm261_vm0, %v413_v55 }
 0x1a8   : > { %768 = shalt.err (!%p765_p3)
}
 0x1a9   : > { %s805_s12 = smov 128   ;;  %s806_s13 = smov 8  }
 0x1aa   : > { %684 = dma.vmem_to_hbm [thread:$0]  (%p870_p5), %s536_s29, 512, %s538_s30, %s520_s5, %s805_s12, %s805_s12, %s806_s13  }
 0x1ab   : > { %s248_s22 = scalar_lea.vmem %s967_s3, %s882_s28 }
 0x216   : > { %v438_v56 = vpop.f32.mrf.mxu0 }
 0x217   : > { %510 = vst.msk [vmem:[%s248_s22] sm:$0xff] %vm261_vm0, %v438_v56 }
 0x21e   : > { %v461_v57 = vpop.f32.mrf.mxu1 }
 0x21f   : > { %511 = vst.msk [vmem:[%s248_s22 + $0x8] sm:$0xff] %vm261_vm0, %v461_v57 }
 0x222   : > { %v484_v58 = vpop.f32.mrf.mxu2 }
 0x223   : > { %512 = vst.msk [vmem:[%s248_s22 + $0x10] sm:$0xff] %vm261_vm0, %v484_v58 }
 0x22a   : > { %v507_v59 = vpop.f32.mrf.mxu3 }
 0x22b   : > { %513 = vst.msk [vmem:[%s248_s22 + $0x18] sm:$0xff] %vm261_vm0, %v507_v59 }
 0x22c PF: > { %p690_p4 = scmp.ge.s32.totalorder %s803_s18, 2  ;;  %s560_s25 = sand.u32 1, %s791_s15  }
 0x22d   : > { %s561_s28 = scalar_lea.sflag [#allocation3], %s560_s25 }
 0x22e   : > { %p687_p5 = pnand %p690_p4, %p874_p6 }
 0x230   : > { %p688_p7 = pneg %p687_p5 }
 0x232   : > { %786 = dma.done.wait (%p688_p7), %s561_s28, 512  }
 0x233   : > { %788 = vsyncadd (%p688_p7), %s561_s28, 4294966784  ;;  %p15_p8 = scmp.ge.s32.totalorder %s857_s21, 4   ;;  %s971_s15 = smov %s795_s16 }
 0x234   : > { %s972_s16 = smov %s799_s17  ;;  %s973_s17 = smov %s868_s24 }
 0x235   : > { %s974_s18 = smov %s857_s21  ;;  %17 = sbr.rel (!%p15_p8) target bundleno = 3 (0x3), region = 85 }
 0x23a   :  { %567 = vsyncpa [#allocation3], 1 }
 0x23b   :  { %569 = vsyncpa [#allocation3 + $0x1], 1 }

// kernel: encoder_block_forward.7
= control target key start
LH: loop header
LB: loop body
LE: loop exit
PB: predicated region body
PF: predicated region fallthrough
CT: control target
= control target key end

     0   :  { %s842_s0 = inlined_call_operand.vmem [shape: f32[8,2,128], index: 0, kind: input, shape index: {}]   ;;  %s843_s1 = inlined_call_operand.vmem [shape: f32[32,128], index: 1, kind: input, shape index: {}]   ;;  %s844_s2 = inlined_call_operand.vmem [shape: f32[8,2,32], index: 2, kind: output, shape index: {0}]   ;;  %s845_s3 = inlined_call_operand.hbm [shape: f32[2,32], index: 3, kind: output, shape index: {1}]  }
   0x1   :  { %v17_v0 = vld [vmem:[%s843_s1 + $0x18] sm:$0xff]  ;;  %v16_v1 = vld [vmem:[%s843_s1 + $0x10] sm:$0xff] }
   0x2   :  { %35 = vmatpush.msra.mxu0 %v17_v0  ;;  %103 = vmatpush.msra.mxu1 %v17_v0 }
   0x3   :  { %9 = vsyncpa [#allocation3], 0  ;;  %v15_v2 = vld [vmem:[%s843_s1 + $0x8] sm:$0xff]  ;;  %171 = vmatpush.msra.mxu2 %v17_v0  ;;  %239 = vmatpush.msra.mxu3 %v17_v0  ;;  %v14_v3 = vld [vmem:[%s843_s1] sm:$0xff]  ;;  %v707_v4 = vmov 0.0   ;;  %s708_s21 = smov 64  }
   0x4   :  { %36 = vmatpush.msra.mxu0 %v16_v1  ;;  %104 = vmatpush.msra.mxu1 %v16_v1  ;;  %v18_v5 = vld [vmem:[%s842_s0] sm:$0x3]  ;;  %s709_s22 = smov 32   ;;  %vm85_vm4 = vcmask 254976   ;;  %vm19_vm5 = vcmask 261120   ;;  %s573_s28 = sshll.u32 %s845_s3, 4  ;;  %s574_s28 = int_to_ptr.hbm [resolvable:$true] %s573_s28 }
   0x5   :  { %172 = vmatpush.msra.mxu2 %v16_v1  ;;  %240 = vmatpush.msra.mxu3 %v16_v1  ;;  %v585_v31 = vld [vmem:[%s842_s0 + $0x2] sm:$0x3]  ;;  %v589_v57 = vld [vmem:[%s842_s0 + $0x4] sm:$0x3] }
   0x6   :  { %37 = vmatpush.msra.mxu0 %v15_v2  ;;  %105 = vmatpush.msra.mxu1 %v15_v2 }
   0x7   :  { %173 = vmatpush.msra.mxu2 %v15_v2  ;;  %241 = vmatpush.msra.mxu3 %v15_v2 }
   0x8   :  { %38 = vmatpush.msra.mxu0 %v14_v3  ;;  %106 = vmatpush.msra.mxu1 %v14_v3 }
   0x9   :  { %39 = vmatmul.f32.vlgmr.msra.gmra.mxu0 %v707_v4  ;;  %174 = vmatpush.msra.mxu2 %v14_v3 }
   0xa   :  { %242 = vmatpush.msra.mxu3 %v14_v3  ;;  %307 = vmatpush.msrb.mxu0 %v17_v0 }
   0xb   :  { %375 = vmatpush.msrb.mxu1 %v17_v0  ;;  %443 = vmatpush.msrb.mxu2 %v17_v0 }
   0xc   :  { %308 = vmatpush.msrb.mxu0 %v16_v1  ;;  %511 = vmatpush.msrb.mxu3 %v17_v0 }
   0xd   :  { %376 = vmatpush.msrb.mxu1 %v16_v1  ;;  %444 = vmatpush.msrb.mxu2 %v16_v1 }
   0xe   :  { %309 = vmatpush.msrb.mxu0 %v15_v2  ;;  %512 = vmatpush.msrb.mxu3 %v16_v1 }
   0xf   :  { %377 = vmatpush.msrb.mxu1 %v15_v2  ;;  %445 = vmatpush.msrb.mxu2 %v15_v2 }
  0x10   :  { %310 = vmatpush.msrb.mxu0 %v14_v3  ;;  %513 = vmatpush.msrb.mxu3 %v15_v2 }
  0x11   :  { %378 = vmatpush.msrb.mxu1 %v14_v3  ;;  %446 = vmatpush.msrb.mxu2 %v14_v3 }
  0x12   :  { %514 = vmatpush.msrb.mxu3 %v14_v3 }
  0x86   :  { %v40_v6 = vpop.f32.mrf.mxu0 }
  0x87   :  { %v43_v7 = vadd.f32 %v40_v6, %v18_v5 }
  0x89   :  { %617 = vtanh.f32 %v43_v7  ;;  %v584_v9 = vmul.f32 -1.442695, %v43_v7 }
  0x8b   :  { %619 = vpow2.f32 %v584_v9 }
  0x8f   :  { %v618_v8 = vpop.eup %617 }
  0x90   :  { %66 = vrot.lane.b32.xlu0 %v618_v8, %s708_s21 }
  0x91   :  { %v620_v10 = vpop.eup %619 }
  0x92   :  { %v47_v11 = vadd.f32 1.0, %v620_v10 }
  0x94   :  { %621 = vrcp.f32 %v47_v11  ;;  %v59_v17 = vand.u32 2147483648, %v47_v11  ;;  %vm53_vm1 = vweird.f32 %v47_v11  ;;  %v57_v18 = vand.u32 2147483647, %v47_v11 }
  0x96   :  { %v60_v20 = vor.u32 1.1754944e-38, %v59_v17  ;;  %vm58_vm3 = vcmp.eq.f32.partialorder %v57_v18, 8.507059e+37 }
  0x9a   :  { %v622_v12 = vpop.eup %621 }
  0x9b   :  { %v49_v13 = vmul.f32 %v622_v12, %v47_v11  ;;  %vm54_vm0 = vweird.f32 %v622_v12 }
  0x9c   :  { %vm55_vm2 = vmor %vm53_vm1, %vm54_vm0 }
  0x9d   :  { %v50_v14 = vsub.f32 1.0, %v49_v13 }
  0x9f   :  { %v51_v15 = vmul.f32 %v622_v12, %v50_v14 }
  0xa1   :  { %v52_v16 = vadd.f32 %v622_v12, %v51_v15 }
  0xa3   :  { %v56_v19 = vsel %vm55_vm2, %v622_v12, %v52_v16 }
  0xa4   :  { %v61_v22 = vsel %vm58_vm3, %v60_v20, %v56_v19  ;;  %v593_v19 = vld [vmem:[%s842_s0 + $0x6] sm:$0x3] }
  0xa5   :  { %v64_v24 = vmul.f32 0.0, %v61_v22 }
 0x102   :  { %v67_v21 = vpop.permute.xlu0 %66 }
 0x103   :  { %v69_v23 = vmul.f32 %v67_v21, %v61_v22 }
 0x105   :  { %71 = vrot.lane.b32.xlu0 %v69_v23, %s709_s22 }
 0x177   :  { %v72_v25 = vpop.permute.xlu0 %71 }
 0x178   :  { %v74_v26 = vadd.f32 %v72_v25, %v64_v24 }
 0x17a   :  { %623 = vtanh.f32 %v74_v26 }
 0x180   :  { %v624_v27 = vpop.eup %623 }
 0x181   :  { %77 = vrot.lane.b32.xlu1 %v624_v27, %s708_s21 }
 0x1f3   :  { %v78_v28 = vpop.permute.xlu1 %77 }
 0x1f4   :  { %v80_v29 = vmul.f32 %v78_v28, %v61_v22 }
 0x1f6   :  { %82 = vrot.lane.b32.xlu1 %v80_v29, %s709_s22 }
 0x268   :  { %v83_v30 = vpop.permute.xlu1 %82 }
 0x269   :  { %86 = vst.msk [vmem:[%s844_s2] sm:$0x3] %vm85_vm4, %v83_v30  ;;  %586 = vmatmul.msk.f32.vlgmr.msra.gmra.mxu1 %vm19_vm5, %v83_v30 }
 0x2e6   :  { %v108_v32 = vpop.f32.mrf.mxu1 }
 0x2e7   :  { %v111_v33 = vadd.f32 %v585_v31, %v108_v32 }
 0x2e9   :  { %625 = vtanh.f32 %v111_v33  ;;  %v587_v35 = vmul.f32 -1.442695, %v111_v33 }
 0x2eb   :  { %627 = vpow2.f32 %v587_v35 }
 0x2ef   :  { %v626_v34 = vpop.eup %625 }
 0x2f0   :  { %134 = vrot.lane.b32.xlu2 %v626_v34, %s708_s21 }
 0x2f1   :  { %v628_v36 = vpop.eup %627 }
 0x2f2   :  { %v115_v37 = vadd.f32 1.0, %v628_v36 }
 0x2f4   :  { %629 = vrcp.f32 %v115_v37  ;;  %v127_v43 = vand.u32 2147483648, %v115_v37  ;;  %vm121_vm7 = vweird.f32 %v115_v37  ;;  %v125_v44 = vand.u32 2147483647, %v115_v37 }
 0x2f6   :  { %v128_v46 = vor.u32 1.1754944e-38, %v127_v43  ;;  %vm126_vm9 = vcmp.eq.f32.partialorder %v125_v44, 8.507059e+37 }
 0x2fa   :  { %v630_v38 = vpop.eup %629 }
 0x2fb   :  { %v117_v39 = vmul.f32 %v630_v38, %v115_v37  ;;  %vm122_vm6 = vweird.f32 %v630_v38 }
 0x2fc   :  { %vm123_vm8 = vmor %vm121_vm7, %vm122_vm6 }
 0x2fd   :  { %v118_v40 = vsub.f32 1.0, %v117_v39 }
 0x2ff   :  { %v119_v41 = vmul.f32 %v630_v38, %v118_v40 }
 0x301   :  { %v120_v42 = vadd.f32 %v630_v38, %v119_v41 }
 0x303   :  { %v124_v45 = vsel %vm123_vm8, %v630_v38, %v120_v42 }
 0x304   :  { %v129_v48 = vsel %vm126_vm9, %v128_v46, %v124_v45  ;;  %v597_v45 = vld [vmem:[%s842_s0 + $0x8] sm:$0x3] }
 0x305   :  { %v132_v50 = vmul.f32 %v129_v48, %v74_v26 }
 0x34a   :  { %v135_v47 = vpop.permute.xlu2 %134 }
 0x34b   :  { %v137_v49 = vmul.f32 %v135_v47, %v129_v48 }
 0x34d   :  { %139 = vrot.lane.b32.xlu2 %v137_v49, %s709_s22 }
 0x3a7   :  { %v140_v51 = vpop.permute.xlu2 %139 }
 0x3a8   :  { %v142_v52 = vadd.f32 %v140_v51, %v132_v50 }
 0x3aa   :  { %631 = vtanh.f32 %v142_v52 }
 0x3b0   :  { %v632_v53 = vpop.eup %631 }
 0x3b1   :  { %145 = vrot.lane.b32.xlu0 %v632_v53, %s708_s21 }
 0x423   :  { %v146_v54 = vpop.permute.xlu0 %145 }
 0x424   :  { %v148_v55 = vmul.f32 %v146_v54, %v129_v48 }
 0x426   :  { %150 = vrot.lane.b32.xlu1 %v148_v55, %s709_s22 }
 0x498   :  { %v151_v56 = vpop.permute.xlu1 %150 }
 0x499   :  { %588 = vst.msk [vmem:[%s844_s2 + $0x2] sm:$0x3] %vm85_vm4, %v151_v56  ;;  %590 = vmatmul.msk.f32.vlgmr.msra.gmra.mxu2 %vm19_vm5, %v151_v56 }
 0x51c   :  { %v176_v58 = vpop.f32.mrf.mxu2 }
 0x51d   :  { %v179_v59 = vadd.f32 %v589_v57, %v176_v58 }
 0x51f   :  { %633 = vtanh.f32 %v179_v59  ;;  %v591_v61 = vmul.f32 -1.442695, %v179_v59 }
 0x521   :  { %635 = vpow2.f32 %v591_v61 }
 0x525   :  { %v634_v60 = vpop.eup %633 }
 0x526   :  { %202 = vrot.lane.b32.xlu2 %v634_v60, %s708_s21 }
 0x527   :  { %v636_v62 = vpop.eup %635 }
 0x528   :  { %v183_v63 = vadd.f32 1.0, %v636_v62 }
 0x52a   :  { %637 = vrcp.f32 %v183_v63  ;;  %v195_v5 = vand.u32 2147483648, %v183_v63  ;;  %vm189_vm11 = vweird.f32 %v183_v63  ;;  %v193_v6 = vand.u32 2147483647, %v183_v63 }
 0x52c   :  { %v196_v8 = vor.u32 1.1754944e-38, %v195_v5  ;;  %vm194_vm13 = vcmp.eq.f32.partialorder %v193_v6, 8.507059e+37 }
 0x530   :  { %v638_v0 = vpop.eup %637 }
 0x531   :  { %v185_v1 = vmul.f32 %v638_v0, %v183_v63  ;;  %vm190_vm10 = vweird.f32 %v638_v0 }
 0x532   :  { %vm191_vm12 = vmor %vm189_vm11, %vm190_vm10 }
 0x533   :  { %v186_v2 = vsub.f32 1.0, %v185_v1 }
 0x535   :  { %v187_v3 = vmul.f32 %v638_v0, %v186_v2 }
 0x537   :  { %v188_v4 = vadd.f32 %v638_v0, %v187_v3 }
 0x539   :  { %v192_v7 = vsel %vm191_vm12, %v638_v0, %v188_v4 }
 0x53a   :  { %v197_v10 = vsel %vm194_vm13, %v196_v8, %v192_v7  ;;  %v601_v7 = vld [vmem:[%s842_s0 + $0xa] sm:$0x3] }
 0x53b   :  { %v200_v12 = vmul.f32 %v197_v10, %v142_v52 }
 0x580   :  { %v203_v9 = vpop.permute.xlu2 %202 }
 0x581   :  { %v205_v11 = vmul.f32 %v203_v9, %v197_v10 }
 0x583   :  { %207 = vrot.lane.b32.xlu0 %v205_v11, %s709_s22 }
 0x5f5   :  { %v208_v13 = vpop.permute.xlu0 %207 }
 0x5f6   :  { %v210_v14 = vadd.f32 %v208_v13, %v200_v12 }
 0x5f8   :  { %639 = vtanh.f32 %v210_v14 }
 0x5fe   :  { %v640_v15 = vpop.eup %639 }
 0x5ff   :  { %213 = vrot.lane.b32.xlu1 %v640_v15, %s708_s21 }
 0x671   :  { %v214_v16 = vpop.permute.xlu1 %213 }
 0x672   :  { %v216_v17 = vmul.f32 %v214_v16, %v197_v10 }
 0x674   :  { %218 = vrot.lane.b32.xlu2 %v216_v17, %s709_s22 }
 0x6ce   :  { %v219_v18 = vpop.permute.xlu2 %218 }
 0x6cf   :  { %592 = vst.msk [vmem:[%s844_s2 + $0x4] sm:$0x3] %vm85_vm4, %v219_v18  ;;  %594 = vmatmul.msk.f32.vlgmr.msra.gmra.mxu3 %vm19_vm5, %v219_v18 }
 0x752   :  { %v244_v20 = vpop.f32.mrf.mxu3 }
 0x753   :  { %v247_v21 = vadd.f32 %v593_v19, %v244_v20 }
 0x755   :  { %641 = vtanh.f32 %v247_v21  ;;  %v595_v23 = vmul.f32 -1.442695, %v247_v21 }
 0x757   :  { %643 = vpow2.f32 %v595_v23 }
 0x75b   :  { %v642_v22 = vpop.eup %641 }
 0x75c   :  { %270 = vrot.lane.b32.xlu0 %v642_v22, %s708_s21 }
 0x75d   :  { %v644_v24 = vpop.eup %643 }
 0x75e   :  { %v251_v25 = vadd.f32 1.0, %v644_v24 }
 0x760   :  { %645 = vrcp.f32 %v251_v25  ;;  %v263_v31 = vand.u32 2147483648, %v251_v25  ;;  %vm257_vm15 = vweird.f32 %v251_v25  ;;  %v261_v32 = vand.u32 2147483647, %v251_v25 }
 0x762   :  { %v264_v34 = vor.u32 1.1754944e-38, %v263_v31  ;;  %vm262_vm1 = vcmp.eq.f32.partialorder %v261_v32, 8.507059e+37 }
 0x766   :  { %v646_v26 = vpop.eup %645 }
 0x767   :  { %v253_v27 = vmul.f32 %v646_v26, %v251_v25  ;;  %vm258_vm14 = vweird.f32 %v646_v26 }
 0x768   :  { %vm259_vm0 = vmor %vm257_vm15, %vm258_vm14 }
 0x769   :  { %v254_v28 = vsub.f32 1.0, %v253_v27 }
 0x76b   :  { %v255_v29 = vmul.f32 %v646_v26, %v254_v28 }
 0x76d   :  { %v256_v30 = vadd.f32 %v646_v26, %v255_v29 }
 0x76f   :  { %v260_v33 = vsel %vm259_vm0, %v646_v26, %v256_v30 }
 0x770   :  { %v265_v36 = vsel %vm262_vm1, %v264_v34, %v260_v33  ;;  %v605_v33 = vld [vmem:[%s842_s0 + $0xc] sm:$0x3] }
 0x771   :  { %v268_v38 = vmul.f32 %v265_v36, %v210_v14 }
 0x7ce   :  { %v271_v35 = vpop.permute.xlu0 %270 }
 0x7cf   :  { %v273_v37 = vmul.f32 %v271_v35, %v265_v36 }
 0x7d1   :  { %275 = vrot.lane.b32.xlu1 %v273_v37, %s709_s22 }
 0x843   :  { %v276_v39 = vpop.permute.xlu1 %275 }
 0x844   :  { %v278_v40 = vadd.f32 %v276_v39, %v268_v38 }
 0x846   :  { %647 = vtanh.f32 %v278_v40 }
 0x84c   :  { %v648_v41 = vpop.eup %647 }
 0x84d   :  { %281 = vrot.lane.b32.xlu2 %v648_v41, %s708_s21 }
 0x8a7   :  { %v282_v42 = vpop.permute.xlu2 %281 }
 0x8a8   :  { %v284_v43 = vmul.f32 %v282_v42, %v265_v36 }
 0x8aa   :  { %286 = vrot.lane.b32.xlu0 %v284_v43, %s709_s22 }
 0x91c   :  { %v287_v44 = vpop.permute.xlu0 %286 }
 0x91d   :  { %596 = vst.msk [vmem:[%s844_s2 + $0x6] sm:$0x3] %vm85_vm4, %v287_v44  ;;  %598 = vmatmul.msk.f32.vlgmr.msrb.gmra.mxu0 %vm19_vm5, %v287_v44 }
 0x99a   :  { %v312_v46 = vpop.f32.mrf.mxu0 }
 0x99b   :  { %v315_v47 = vadd.f32 %v597_v45, %v312_v46 }
 0x99d   :  { %649 = vtanh.f32 %v315_v47  ;;  %v599_v49 = vmul.f32 -1.442695, %v315_v47 }
 0x99f   :  { %651 = vpow2.f32 %v599_v49 }
 0x9a3   :  { %v650_v48 = vpop.eup %649 }
 0x9a4   :  { %338 = vrot.lane.b32.xlu1 %v650_v48, %s708_s21 }
 0x9a5   :  { %v652_v50 = vpop.eup %651 }
 0x9a6   :  { %v319_v51 = vadd.f32 1.0, %v652_v50 }
 0x9a8   :  { %653 = vrcp.f32 %v319_v51  ;;  %v331_v57 = vand.u32 2147483648, %v319_v51  ;;  %vm325_vm3 = vweird.f32 %v319_v51  ;;  %v329_v58 = vand.u32 2147483647, %v319_v51 }
 0x9aa   :  { %v332_v60 = vor.u32 1.1754944e-38, %v331_v57  ;;  %vm330_vm7 = vcmp.eq.f32.partialorder %v329_v58, 8.507059e+37 }
 0x9ae   :  { %v654_v52 = vpop.eup %653 }
 0x9af   :  { %v321_v53 = vmul.f32 %v654_v52, %v319_v51  ;;  %vm326_vm2 = vweird.f32 %v654_v52 }
 0x9b0   :  { %vm327_vm6 = vmor %vm325_vm3, %vm326_vm2 }
 0x9b1   :  { %v322_v54 = vsub.f32 1.0, %v321_v53 }
 0x9b3   :  { %v323_v55 = vmul.f32 %v654_v52, %v322_v54 }
 0x9b5   :  { %v324_v56 = vadd.f32 %v654_v52, %v323_v55 }
 0x9b7   :  { %v328_v59 = vsel %vm327_vm6, %v654_v52, %v324_v56 }
 0x9b8   :  { %v333_v62 = vsel %vm330_vm7, %v332_v60, %v328_v59  ;;  %v609_v59 = vld [vmem:[%s842_s0 + $0xe] sm:$0x3]  ;;  %s710_s0 = smov [#allocation2]  }
 0x9b9   :  { %v336_v0 = vmul.f32 %v333_v62, %v278_v40  ;;  %s571_s25 = sshll.u32 %s710_s0, 4  ;;  %s572_s25 = int_to_ptr.vmem [resolvable:$true] %s571_s25 }
 0xa16   :  { %v339_v61 = vpop.permute.xlu1 %338 }
 0xa17   :  { %v341_v63 = vmul.f32 %v339_v61, %v333_v62 }
 0xa19   :  { %343 = vrot.lane.b32.xlu2 %v341_v63, %s709_s22 }
 0xa73   :  { %v344_v1 = vpop.permute.xlu2 %343 }
 0xa74   :  { %v346_v2 = vadd.f32 %v344_v1, %v336_v0 }
 0xa76   :  { %655 = vtanh.f32 %v346_v2 }
 0xa7c   :  { %v656_v3 = vpop.eup %655 }
 0xa7d   :  { %349 = vrot.lane.b32.xlu0 %v656_v3, %s708_s21 }
 0xaef   :  { %v350_v4 = vpop.permute.xlu0 %349 }
 0xaf0   :  { %v352_v5 = vmul.f32 %v350_v4, %v333_v62 }
 0xaf2   :  { %354 = vrot.lane.b32.xlu1 %v352_v5, %s709_s22 }
 0xb64   :  { %v355_v6 = vpop.permute.xlu1 %354 }
 0xb65   :  { %600 = vst.msk [vmem:[%s844_s2 + $0x8] sm:$0x3] %vm85_vm4, %v355_v6  ;;  %602 = vmatmul.msk.f32.vlgmr.msrb.gmra.mxu1 %vm19_vm5, %v355_v6 }
 0xbe2   :  { %v380_v8 = vpop.f32.mrf.mxu1 }
 0xbe3   :  { %v383_v9 = vadd.f32 %v601_v7, %v380_v8 }
 0xbe5   :  { %657 = vtanh.f32 %v383_v9  ;;  %v603_v11 = vmul.f32 -1.442695, %v383_v9 }
 0xbe7   :  { %659 = vpow2.f32 %v603_v11 }
 0xbeb   :  { %v658_v10 = vpop.eup %657 }
 0xbec   :  { %406 = vrot.lane.b32.xlu2 %v658_v10, %s708_s21 }
 0xbed   :  { %v660_v12 = vpop.eup %659 }
 0xbee   :  { %v387_v13 = vadd.f32 1.0, %v660_v12 }
 0xbf0   :  { %661 = vrcp.f32 %v387_v13  ;;  %v399_v19 = vand.u32 2147483648, %v387_v13  ;;  %vm393_vm9 = vweird.f32 %v387_v13  ;;  %v397_v20 = vand.u32 2147483647, %v387_v13 }
 0xbf2   :  { %v400_v22 = vor.u32 1.1754944e-38, %v399_v19  ;;  %vm398_vm11 = vcmp.eq.f32.partialorder %v397_v20, 8.507059e+37 }
 0xbf6   :  { %v662_v14 = vpop.eup %661 }
 0xbf7   :  { %v389_v15 = vmul.f32 %v662_v14, %v387_v13  ;;  %vm394_vm8 = vweird.f32 %v662_v14 }
 0xbf8   :  { %vm395_vm10 = vmor %vm393_vm9, %vm394_vm8 }
 0xbf9   :  { %v390_v16 = vsub.f32 1.0, %v389_v15 }
 0xbfb   :  { %v391_v17 = vmul.f32 %v662_v14, %v390_v16 }
 0xbfd   :  { %v392_v18 = vadd.f32 %v662_v14, %v391_v17 }
 0xbff   :  { %v396_v21 = vsel %vm395_vm10, %v662_v14, %v392_v18 }
 0xc00   :  { %v401_v24 = vsel %vm398_vm11, %v400_v22, %v396_v21 }
 0xc01   :  { %v404_v26 = vmul.f32 %v401_v24, %v346_v2 }
 0xc46   :  { %v407_v23 = vpop.permute.xlu2 %406 }
 0xc47   :  { %v409_v25 = vmul.f32 %v407_v23, %v401_v24 }
 0xc49   :  { %411 = vrot.lane.b32.xlu0 %v409_v25, %s709_s22 }
 0xcbb   :  { %v412_v27 = vpop.permute.xlu0 %411 }
 0xcbc   :  { %v414_v28 = vadd.f32 %v412_v27, %v404_v26 }
 0xcbe   :  { %663 = vtanh.f32 %v414_v28 }
 0xcc4   :  { %v664_v29 = vpop.eup %663 }
 0xcc5   :  { %417 = vrot.lane.b32.xlu1 %v664_v29, %s708_s21 }
 0xd37   :  { %v418_v30 = vpop.permute.xlu1 %417 }
 0xd38   :  { %v420_v31 = vmul.f32 %v418_v30, %v401_v24 }
 0xd3a   :  { %422 = vrot.lane.b32.xlu2 %v420_v31, %s709_s22 }
 0xd94   :  { %v423_v32 = vpop.permute.xlu2 %422 }
 0xd95   :  { %604 = vst.msk [vmem:[%s844_s2 + $0xa] sm:$0x3] %vm85_vm4, %v423_v32  ;;  %606 = vmatmul.msk.f32.vlgmr.msrb.gmra.mxu2 %vm19_vm5, %v423_v32 }
 0xe18   :  { %v448_v34 = vpop.f32.mrf.mxu2 }
 0xe19   :  { %v451_v35 = vadd.f32 %v605_v33, %v448_v34 }
 0xe1b   :  { %665 = vtanh.f32 %v451_v35  ;;  %v607_v37 = vmul.f32 -1.442695, %v451_v35 }
 0xe1d   :  { %667 = vpow2.f32 %v607_v37 }
 0xe21   :  { %v666_v36 = vpop.eup %665 }
 0xe22   :  { %474 = vrot.lane.b32.xlu0 %v666_v36, %s708_s21 }
 0xe23   :  { %v668_v38 = vpop.eup %667 }
 0xe24   :  { %v455_v39 = vadd.f32 1.0, %v668_v38 }
 0xe26   :  { %669 = vrcp.f32 %v455_v39  ;;  %v467_v45 = vand.u32 2147483648, %v455_v39  ;;  %vm461_vm13 = vweird.f32 %v455_v39  ;;  %v465_v46 = vand.u32 2147483647, %v455_v39 }
 0xe28   :  { %v468_v48 = vor.u32 1.1754944e-38, %v467_v45  ;;  %vm466_vm15 = vcmp.eq.f32.partialorder %v465_v46, 8.507059e+37 }
 0xe2c   :  { %v670_v40 = vpop.eup %669 }
 0xe2d   :  { %v457_v41 = vmul.f32 %v670_v40, %v455_v39  ;;  %vm462_vm12 = vweird.f32 %v670_v40 }
 0xe2e   :  { %vm463_vm14 = vmor %vm461_vm13, %vm462_vm12 }
 0xe2f   :  { %v458_v42 = vsub.f32 1.0, %v457_v41 }
 0xe31   :  { %v459_v43 = vmul.f32 %v670_v40, %v458_v42 }
 0xe33   :  { %v460_v44 = vadd.f32 %v670_v40, %v459_v43 }
 0xe35   :  { %v464_v47 = vsel %vm463_vm14, %v670_v40, %v460_v44 }
 0xe36   :  { %v469_v50 = vsel %vm466_vm15, %v468_v48, %v464_v47 }
 0xe37   :  { %v472_v52 = vmul.f32 %v469_v50, %v414_v28 }
 0xe94   :  { %v475_v49 = vpop.permute.xlu0 %474 }
 0xe95   :  { %v477_v51 = vmul.f32 %v475_v49, %v469_v50 }
 0xe97   :  { %479 = vrot.lane.b32.xlu1 %v477_v51, %s709_s22 }
 0xf09   :  { %v480_v53 = vpop.permute.xlu1 %479 }
 0xf0a   :  { %v482_v54 = vadd.f32 %v480_v53, %v472_v52 }
 0xf0c   :  { %671 = vtanh.f32 %v482_v54 }
 0xf12   :  { %v672_v55 = vpop.eup %671 }
 0xf13   :  { %485 = vrot.lane.b32.xlu2 %v672_v55, %s708_s21 }
 0xf6d   :  { %v486_v56 = vpop.permute.xlu2 %485 }
 0xf6e   :  { %v488_v57 = vmul.f32 %v486_v56, %v469_v50 }
 0xf70   :  { %490 = vrot.lane.b32.xlu0 %v488_v57, %s709_s22 }
 0xfe2   :  { %v491_v58 = vpop.permute.xlu0 %490 }
 0xfe3   :  { %608 = vst.msk [vmem:[%s844_s2 + $0xc] sm:$0x3] %vm85_vm4, %v491_v58  ;;  %610 = vmatmul.msk.f32.vlgmr.msrb.gmra.mxu3 %vm19_vm5, %v491_v58 }
0x1066   :  { %v516_v60 = vpop.f32.mrf.mxu3 }
0x1067   :  { %v519_v61 = vadd.f32 %v609_v59, %v516_v60 }
0x1069   :  { %673 = vtanh.f32 %v519_v61  ;;  %v611_v63 = vmul.f32 -1.442695, %v519_v61 }
0x106b   :  { %675 = vpow2.f32 %v611_v63 }
0x106f   :  { %v674_v62 = vpop.eup %673 }
0x1070   :  { %542 = vrot.lane.b32.xlu1 %v674_v62, %s708_s21 }
0x1071   :  { %v676_v0 = vpop.eup %675 }
0x1072   :  { %v523_v1 = vadd.f32 1.0, %v676_v0 }
0x1074   :  { %677 = vrcp.f32 %v523_v1  ;;  %v535_v7 = vand.u32 2147483648, %v523_v1  ;;  %vm529_vm0 = vweird.f32 %v523_v1  ;;  %v533_v8 = vand.u32 2147483647, %v523_v1 }
0x1076   :  { %v536_v10 = vor.u32 1.1754944e-38, %v535_v7  ;;  %vm534_vm2 = vcmp.eq.f32.partialorder %v533_v8, 8.507059e+37 }
0x107a   :  { %v678_v2 = vpop.eup %677 }
0x107b   :  { %v525_v3 = vmul.f32 %v678_v2, %v523_v1  ;;  %vm530_vm5 = vweird.f32 %v678_v2 }
0x107c   :  { %vm531_vm1 = vmor %vm529_vm0, %vm530_vm5 }
0x107d   :  { %v526_v4 = vsub.f32 1.0, %v525_v3 }
0x107f   :  { %v527_v5 = vmul.f32 %v678_v2, %v526_v4 }
0x1081   :  { %v528_v6 = vadd.f32 %v678_v2, %v527_v5 }
0x1083   :  { %v532_v9 = vsel %vm531_vm1, %v678_v2, %v528_v6 }
0x1084   :  { %v537_v12 = vsel %vm534_vm2, %v536_v10, %v532_v9 }
0x1085   :  { %v540_v14 = vmul.f32 %v537_v12, %v482_v54 }
0x10e2   :  { %v543_v11 = vpop.permute.xlu1 %542 }
0x10e3   :  { %v545_v13 = vmul.f32 %v543_v11, %v537_v12 }
0x10e5   :  { %547 = vrot.lane.b32.xlu2 %v545_v13, %s709_s22 }
0x113f   :  { %v548_v15 = vpop.permute.xlu2 %547 }
0x1140   :  { %v550_v16 = vadd.f32 %v548_v15, %v540_v14 }
0x1142   :  { %679 = vtanh.f32 %v550_v16 }
0x1148   :  { %v680_v17 = vpop.eup %679 }
0x1149   :  { %553 = vrot.lane.b32.xlu0 %v680_v17, %s708_s21 }
0x11bb   :  { %v554_v18 = vpop.permute.xlu0 %553 }
0x11bc   :  { %v556_v19 = vmul.f32 %v554_v18, %v537_v12 }
0x11be   :  { %558 = vrot.lane.b32.xlu1 %v556_v19, %s709_s22 }
0x1230   :  { %v559_v20 = vpop.permute.xlu1 %558 }
0x1231   :  { %612 = vst.msk [vmem:[%s844_s2 + $0xe] sm:$0x3] %vm85_vm4, %v559_v20 }
0x1232   :  { %563 = vst.msk [vmem:[#allocation2] sm:$0x3] %vm85_vm4, %v559_v20 }
0x1233   :  { %576 = dma.vmem_to_hbm [thread:$0]  %s572_s25, 32, %s574_s28, [#allocation3]  }
0x1234   :  { %705 = dma.done.wait [#allocation3], 32  }
0x1235   :  { %706 = vsyncadd [#allocation3], 4294967264 }
0x1236   :  { %583 = vsyncpa [#allocation3], 1 }

</bundles_post_ra>
